<compile_context>
chip_gen: v7x
topology: tpu7x:2x2x1
jax: 0.10.0
libtpu: 0.0.40
codegen_flags: <defaults>
</compile_context>

<pallas_src>
import functools
import math

import jax
import jax.numpy as jnp
from jax import lax
from jax.experimental import pallas as pl
from jax.experimental.pallas import tpu as pltpu


# ---------------------------------------------------------------------------
# Kernel
# ---------------------------------------------------------------------------
def _attention_kernel(x_ref, g_ref, wq_ref, wk_ref, wv_ref, wo_ref, bo_ref,
                      o_ref, *, num_heads, head_dim, scale):
    # x_ref : (N, C)   normalized-input source (one batch element)
    # g_ref : (1, C)   LayerNorm gamma
    # wq/wk/wv_ref : (C, DH)  dense block-diagonal grouped-conv weights
    # wo_ref: (DH, C)  output-projection weight (transposed)
    # bo_ref: (1, C)   output-projection bias
    # o_ref : (N, C)   result
    x = x_ref[...]                                   # (N, C)
    gamma = g_ref[...]                               # (1, C)

    # --- LayerNorm over channels (unbiased=False, eps=1e-5 for f32) ---------
    mean = jnp.mean(x, axis=-1, keepdims=True)       # (N, 1)
    xc = x - mean
    var = jnp.mean(xc * xc, axis=-1, keepdims=True)  # (N, 1)
    xn = xc * lax.rsqrt(var + 1e-5) * gamma          # (N, C)

    # --- grouped 1x1x1 conv projections (block-diagonal dense matmuls) ------
    q = jnp.dot(xn, wq_ref[...], preferred_element_type=jnp.float32)  # (N, DH)
    k = jnp.dot(xn, wk_ref[...], preferred_element_type=jnp.float32)  # (N, DH)
    v = jnp.dot(xn, wv_ref[...], preferred_element_type=jnp.float32)  # (N, DH)

    wo = wo_ref[...]                                 # (DH, C)

    # Output accumulator: bias + residual (residual is the *normalized* x,
    # matching the PyTorch module which overwrites x with prenorm(x)).
    acc = bo_ref[...] + xn                           # (N, C)

    # --- per-head attention, folded straight into the output projection -----
    # (no lane-axis concatenate: each head contributes (attn_h @ v_h) @ Wout_h)
    d = head_dim
    for h in range(num_heads):
        qh = q[:, h * d:(h + 1) * d] * scale         # (N, d)
        kh = k[:, h * d:(h + 1) * d]                 # (N, d)
        vh = v[:, h * d:(h + 1) * d]                 # (N, d)

        # sim[i, j] = sum_d qh[i, d] * kh[j, d]   (contraction on last dims,
        # no explicit transpose needed)
        sim = lax.dot_general(qh, kh, (((1,), (1,)), ((), ())),
                              preferred_element_type=jnp.float32)     # (N, N)
        sim = sim - jnp.max(sim, axis=-1, keepdims=True)
        p = jnp.exp(sim)
        attn = p / jnp.sum(p, axis=-1, keepdims=True)                 # (N, N)

        oh = jnp.dot(attn, vh, preferred_element_type=jnp.float32)    # (N, d)
        acc = acc + jnp.dot(oh, wo[h * d:(h + 1) * d, :],
                            preferred_element_type=jnp.float32)       # (N, C)

    o_ref[...] = acc.astype(o_ref.dtype)


# ---------------------------------------------------------------------------
# Wrapper
# ---------------------------------------------------------------------------
def _grouped_to_dense(w, dim, dim_head, groups):
    """Grouped 1x1x1 conv weight (dim_head, dim//groups) -> dense (dim, dim_head)
    block-diagonal matrix so that (x @ W) == grouped_conv(x)."""
    d_per = dim_head // groups
    blocks = [w[g * d_per:(g + 1) * d_per, :].T for g in range(groups)]
    return jax.scipy.linalg.block_diag(*blocks)      # (dim, dim_head)


def attention_forward(x, gamma, wq, wk, wv, wo, bo, *, num_heads, dim_head):
    """Pallas equivalent of Attention(dim, num_heads, dim_head).forward(x).

    x     : (B, C, Z, H, W) float
    gamma : (C,)            LayerNorm scale (module's `g`)
    wq/wk/wv : (dim_head, C // num_heads)   grouped conv weights (no bias)
    wo    : (C, dim_head)   output conv weight
    bo    : (C,)            output conv bias
    """
    b, c, z, hh, ww = x.shape
    assert c % num_heads == 0 and dim_head % num_heads == 0
    n = z * hh * ww
    d = dim_head // num_heads
    scale = (dim_head / num_heads) ** (-0.5)

    # layout plumbing: channels -> lanes, flattened spatial -> sublanes
    x_bnc = jnp.transpose(x.reshape(b, c, n), (0, 2, 1)).astype(jnp.float32)

    wq_d = _grouped_to_dense(wq.astype(jnp.float32), c, dim_head, num_heads)
    wk_d = _grouped_to_dense(wk.astype(jnp.float32), c, dim_head, num_heads)
    wv_d = _grouped_to_dense(wv.astype(jnp.float32), c, dim_head, num_heads)
    wo_t = wo.astype(jnp.float32).T                  # (dim_head, C)
    gamma2 = gamma.astype(jnp.float32).reshape(1, c)
    bo2 = bo.astype(jnp.float32).reshape(1, c)

    kernel = functools.partial(_attention_kernel, num_heads=num_heads,
                               head_dim=d, scale=scale)

    out = pl.pallas_call(
        kernel,
        out_shape=jax.ShapeDtypeStruct((b, n, c), jnp.float32),
        grid_spec=pl.GridSpec(
            grid=(b,),
            in_specs=[
                pl.BlockSpec((None, n, c), lambda i: (i, 0, 0)),   # x
                pl.BlockSpec((1, c), lambda i: (0, 0)),            # gamma
                pl.BlockSpec((c, dim_head), lambda i: (0, 0)),     # Wq
                pl.BlockSpec((c, dim_head), lambda i: (0, 0)),     # Wk
                pl.BlockSpec((c, dim_head), lambda i: (0, 0)),     # Wv
                pl.BlockSpec((dim_head, c), lambda i: (0, 0)),     # Wout^T
                pl.BlockSpec((1, c), lambda i: (0, 0)),            # bias
            ],
            out_specs=pl.BlockSpec((None, n, c), lambda i: (i, 0, 0)),
        ),
        compiler_params=pltpu.CompilerParams(
            dimension_semantics=("parallel",)),
    )(x_bnc, gamma2, wq_d, wk_d, wv_d, wo_t, bo2)

    return jnp.transpose(out, (0, 2, 1)).reshape(b, c, z, hh, ww)


# ---------------------------------------------------------------------------
# Pure-JAX reference (mirrors the PyTorch module op-for-op)
# ---------------------------------------------------------------------------
def attention_reference(x, gamma, wq, wk, wv, wo, bo, num_heads, dim_head):
    b, c, z, hh, ww = x.shape
    H = num_heads
    d = dim_head // H
    c_per = c // H
    hp = lax.Precision.HIGHEST

    eps = 1e-5
    mean = jnp.mean(x, axis=1, keepdims=True)
    var = jnp.mean((x - mean) ** 2, axis=1, keepdims=True)
    xn = (x - mean) * lax.rsqrt(var + eps) * gamma.reshape(1, c, 1, 1, 1)

    n = z * hh * ww
    xf = xn.reshape(b, c, n)

    def grouped_proj(w):
        outs = []
        for g in range(H):
            wg = w[g * d:(g + 1) * d, :]                       # (d, c_per)
            xg = xf[:, g * c_per:(g + 1) * c_per, :]           # (b, c_per, n)
            outs.append(jnp.einsum('oc,bcn->bon', wg, xg, precision=hp))
        return jnp.concatenate(outs, axis=1)                   # (b, dim_head, n)

    q = grouped_proj(wq)
    k = grouped_proj(wk)
    v = grouped_proj(wv)

    scale = (dim_head / H) ** (-0.5)
    q = q.reshape(b, H, d, n) * scale
    k = k.reshape(b, H, d, n)
    v = v.reshape(b, H, d, n)

    sim = jnp.einsum('bhdi,bhdj->bhij', q, k, precision=hp)
    attn = jax.nn.softmax(sim, axis=-1)
    out = jnp.einsum('bhij,bhdj->bhid', attn, v, precision=hp)  # (b, H, n, d)
    out = jnp.transpose(out, (0, 1, 3, 2)).reshape(b, dim_head, n)
    out = jnp.einsum('oc,bcn->bon', wo, out, precision=hp) + bo.reshape(1, c, 1)
    return out.reshape(b, c, z, hh, ww) + xn


# ---------------------------------------------------------------------------
if __name__ == "__main__":
    dim = 32
    num_heads = 4
    dim_head = dim                 # module default: dim_head = dim
    b, z, hh, ww = 2, 4, 4, 4      # -> sequence length N = 64

    key = jax.random.PRNGKey(0)
    ks = jax.random.split(key, 7)
    c_per = dim // num_heads

    x = jax.random.normal(ks[0], (b, dim, z, hh, ww), dtype=jnp.float32)
    gamma = 1.0 + 0.1 * jax.random.normal(ks[1], (dim,), dtype=jnp.float32)
    wq = jax.random.normal(ks[2], (dim_head, c_per), jnp.float32) / (c_per ** 0.5)
    wk = jax.random.normal(ks[3], (dim_head, c_per), jnp.float32) / (c_per ** 0.5)
    wv = jax.random.normal(ks[4], (dim_head, c_per), jnp.float32) / (c_per ** 0.5)
    wo = jax.random.normal(ks[5], (dim, dim_head), jnp.float32) / (dim_head ** 0.5)
    bo = 0.1 * jax.random.normal(ks[6], (dim,), jnp.float32)

    out = attention_forward(x, gamma, wq, wk, wv, wo, bo,
                            num_heads=num_heads, dim_head=dim_head)
    out = jax.block_until_ready(out)

    ref = attention_reference(x, gamma, wq, wk, wv, wo, bo, num_heads, dim_head)
    assert out.shape == x.shape
    assert jnp.allclose(out, ref, atol=1e-3, rtol=1e-3), (
        f"mismatch vs reference: max abs diff = {jnp.max(jnp.abs(out - ref))}")

    print("KERNEL_OK")
</pallas_src>

<mosaic_0001>
module attributes {stable_mosaic.version = 11 : i64} {
  func.func @_attention_kernel(%arg0: i32, %arg1: memref<1x64x32xf32, #tpu.memory_space<vmem>>, %arg2: memref<1x32xf32, #tpu.memory_space<vmem>>, %arg3: memref<32x32xf32, #tpu.memory_space<vmem>>, %arg4: memref<32x32xf32, #tpu.memory_space<vmem>>, %arg5: memref<32x32xf32, #tpu.memory_space<vmem>>, %arg6: memref<32x32xf32, #tpu.memory_space<vmem>>, %arg7: memref<1x32xf32, #tpu.memory_space<vmem>>, %arg8: memref<1x64x32xf32, #tpu.memory_space<vmem>>) attributes {dimension_semantics = [#tpu.dimension_semantics<parallel>], iteration_bounds = array<i64: 2>, scalar_prefetch = 0 : i64, scratch_operands = 0 : i64, tpu.core_type = #tpu.core_type<tc>, window_params = [{transform_indices = @transform_0, window_bounds = array<i64: 1, 64, 32>}, {pipeline_mode = #tpu.pipeline_mode<synchronous>, transform_indices = @transform_1, window_bounds = array<i64: 1, 32>}, {pipeline_mode = #tpu.pipeline_mode<synchronous>, transform_indices = @transform_2, window_bounds = array<i64: 32, 32>}, {pipeline_mode = #tpu.pipeline_mode<synchronous>, transform_indices = @transform_3, window_bounds = array<i64: 32, 32>}, {pipeline_mode = #tpu.pipeline_mode<synchronous>, transform_indices = @transform_4, window_bounds = array<i64: 32, 32>}, {pipeline_mode = #tpu.pipeline_mode<synchronous>, transform_indices = @transform_5, window_bounds = array<i64: 32, 32>}, {pipeline_mode = #tpu.pipeline_mode<synchronous>, transform_indices = @transform_6, window_bounds = array<i64: 1, 32>}, {transform_indices = @transform_7, window_bounds = array<i64: 1, 64, 32>}]} {
    %c0 = arith.constant 0 : index
    %c0_0 = arith.constant 0 : index
    %c0_1 = arith.constant 0 : index
    %0 = vector.load %arg1[%c0, %c0_0, %c0_1] : memref<1x64x32xf32, #tpu.memory_space<vmem>>, vector<1x64x32xf32>
    %1 = vector.shape_cast %0 : vector<1x64x32xf32> to vector<64x32xf32>
    %c0_2 = arith.constant 0 : index
    %c0_3 = arith.constant 0 : index
    %2 = vector.load %arg2[%c0_2, %c0_3] : memref<1x32xf32, #tpu.memory_space<vmem>>, vector<1x32xf32>
    %cst = arith.constant dense<0.000000e+00> : vector<64xf32>
    %3 = vector.multi_reduction <add>, %1, %cst [1] : vector<64x32xf32> to vector<64xf32>
    %4 = vector.shape_cast %3 : vector<64xf32> to vector<64x1xf32>
    %cst_4 = arith.constant 3.200000e+01 : f32
    %5 = vector.broadcast %cst_4 : f32 to vector<64x1xf32>
    %6 = arith.divf %4, %5 : vector<64x1xf32>
    %7 = vector.broadcast %6 : vector<64x1xf32> to vector<64x32xf32>
    %8 = arith.subf %1, %7 : vector<64x32xf32>
    %9 = arith.mulf %8, %8 : vector<64x32xf32>
    %cst_5 = arith.constant dense<0.000000e+00> : vector<64xf32>
    %10 = vector.multi_reduction <add>, %9, %cst_5 [1] : vector<64x32xf32> to vector<64xf32>
    %11 = vector.shape_cast %10 : vector<64xf32> to vector<64x1xf32>
    %cst_6 = arith.constant 3.200000e+01 : f32
    %12 = vector.broadcast %cst_6 : f32 to vector<64x1xf32>
    %13 = arith.divf %11, %12 : vector<64x1xf32>
    %cst_7 = arith.constant 9.99999974E-6 : f32
    %14 = vector.broadcast %cst_7 : f32 to vector<64x1xf32>
    %15 = arith.addf %13, %14 : vector<64x1xf32>
    %16 = math.rsqrt %15 : vector<64x1xf32>
    %17 = vector.broadcast %16 : vector<64x1xf32> to vector<64x32xf32>
    %18 = arith.mulf %8, %17 : vector<64x32xf32>
    %19 = vector.broadcast %2 : vector<1x32xf32> to vector<64x32xf32>
    %20 = arith.mulf %18, %19 : vector<64x32xf32>
    %c0_8 = arith.constant 0 : index
    %c0_9 = arith.constant 0 : index
    %21 = vector.load %arg3[%c0_8, %c0_9] : memref<32x32xf32, #tpu.memory_space<vmem>>, vector<32x32xf32>
    %cst_10 = arith.constant dense<0.000000e+00> : vector<64x32xf32>
    %22 = tpu.matmul %20, %21, %cst_10 {dimension_numbers = #tpu.dot_dimension_numbers<[1], [0], [0], [1], [0, 0, 1, 1], [], []>} : vector<64x32xf32>, vector<32x32xf32>, vector<64x32xf32> -> vector<64x32xf32>
    %c0_11 = arith.constant 0 : index
    %c0_12 = arith.constant 0 : index
    %23 = vector.load %arg4[%c0_11, %c0_12] : memref<32x32xf32, #tpu.memory_space<vmem>>, vector<32x32xf32>
    %cst_13 = arith.constant dense<0.000000e+00> : vector<64x32xf32>
    %24 = tpu.matmul %20, %23, %cst_13 {dimension_numbers = #tpu.dot_dimension_numbers<[1], [0], [0], [1], [0, 0, 1, 1], [], []>} : vector<64x32xf32>, vector<32x32xf32>, vector<64x32xf32> -> vector<64x32xf32>
    %c0_14 = arith.constant 0 : index
    %c0_15 = arith.constant 0 : index
    %25 = vector.load %arg5[%c0_14, %c0_15] : memref<32x32xf32, #tpu.memory_space<vmem>>, vector<32x32xf32>
    %cst_16 = arith.constant dense<0.000000e+00> : vector<64x32xf32>
    %26 = tpu.matmul %20, %25, %cst_16 {dimension_numbers = #tpu.dot_dimension_numbers<[1], [0], [0], [1], [0, 0, 1, 1], [], []>} : vector<64x32xf32>, vector<32x32xf32>, vector<64x32xf32> -> vector<64x32xf32>
    %c0_17 = arith.constant 0 : index
    %c0_18 = arith.constant 0 : index
    %27 = vector.load %arg6[%c0_17, %c0_18] : memref<32x32xf32, #tpu.memory_space<vmem>>, vector<32x32xf32>
    %c0_19 = arith.constant 0 : index
    %c0_20 = arith.constant 0 : index
    %28 = vector.load %arg7[%c0_19, %c0_20] : memref<1x32xf32, #tpu.memory_space<vmem>>, vector<1x32xf32>
    %29 = vector.broadcast %28 : vector<1x32xf32> to vector<64x32xf32>
    %30 = arith.addf %29, %20 : vector<64x32xf32>
    %31 = vector.extract_strided_slice %22 {offsets = [0, 0], sizes = [64, 8], strides = [1, 1]} : vector<64x32xf32> to vector<64x8xf32>
    %cst_21 = arith.constant 0.353553385 : f32
    %32 = vector.broadcast %cst_21 : f32 to vector<64x8xf32>
    %33 = arith.mulf %31, %32 : vector<64x8xf32>
    %34 = vector.extract_strided_slice %24 {offsets = [0, 0], sizes = [64, 8], strides = [1, 1]} : vector<64x32xf32> to vector<64x8xf32>
    %35 = vector.extract_strided_slice %26 {offsets = [0, 0], sizes = [64, 8], strides = [1, 1]} : vector<64x32xf32> to vector<64x8xf32>
    %cst_22 = arith.constant dense<0.000000e+00> : vector<64x64xf32>
    %36 = tpu.matmul %33, %34, %cst_22 {dimension_numbers = #tpu.dot_dimension_numbers<[1], [1], [0], [0], [0, 0, 1, 0], [], []>} : vector<64x8xf32>, vector<64x8xf32>, vector<64x64xf32> -> vector<64x64xf32>
    %cst_23 = arith.constant dense<0xFF800000> : vector<64xf32>
    %37 = vector.multi_reduction <maximumf>, %36, %cst_23 [1] : vector<64x64xf32> to vector<64xf32>
    %38 = vector.shape_cast %37 : vector<64xf32> to vector<64x1xf32>
    %39 = vector.broadcast %38 : vector<64x1xf32> to vector<64x64xf32>
    %40 = arith.subf %36, %39 : vector<64x64xf32>
    %41 = math.exp %40 : vector<64x64xf32>
    %cst_24 = arith.constant dense<0.000000e+00> : vector<64xf32>
    %42 = vector.multi_reduction <add>, %41, %cst_24 [1] : vector<64x64xf32> to vector<64xf32>
    %43 = vector.shape_cast %42 : vector<64xf32> to vector<64x1xf32>
    %44 = vector.broadcast %43 : vector<64x1xf32> to vector<64x64xf32>
    %45 = arith.divf %41, %44 : vector<64x64xf32>
    %cst_25 = arith.constant dense<0.000000e+00> : vector<64x8xf32>
    %46 = tpu.matmul %45, %35, %cst_25 {dimension_numbers = #tpu.dot_dimension_numbers<[1], [0], [0], [1], [0, 0, 1, 1], [], []>} : vector<64x64xf32>, vector<64x8xf32>, vector<64x8xf32> -> vector<64x8xf32>
    %47 = vector.extract_strided_slice %27 {offsets = [0, 0], sizes = [8, 32], strides = [1, 1]} : vector<32x32xf32> to vector<8x32xf32>
    %cst_26 = arith.constant dense<0.000000e+00> : vector<64x32xf32>
    %48 = tpu.matmul %46, %47, %cst_26 {dimension_numbers = #tpu.dot_dimension_numbers<[1], [0], [0], [1], [0, 0, 1, 1], [], []>} : vector<64x8xf32>, vector<8x32xf32>, vector<64x32xf32> -> vector<64x32xf32>
    %49 = arith.addf %30, %48 : vector<64x32xf32>
    %50 = vector.extract_strided_slice %22 {offsets = [0, 8], sizes = [64, 8], strides = [1, 1]} : vector<64x32xf32> to vector<64x8xf32>
    %cst_27 = arith.constant 0.353553385 : f32
    %51 = vector.broadcast %cst_27 : f32 to vector<64x8xf32>
    %52 = arith.mulf %50, %51 : vector<64x8xf32>
    %53 = vector.extract_strided_slice %24 {offsets = [0, 8], sizes = [64, 8], strides = [1, 1]} : vector<64x32xf32> to vector<64x8xf32>
    %54 = vector.extract_strided_slice %26 {offsets = [0, 8], sizes = [64, 8], strides = [1, 1]} : vector<64x32xf32> to vector<64x8xf32>
    %cst_28 = arith.constant dense<0.000000e+00> : vector<64x64xf32>
    %55 = tpu.matmul %52, %53, %cst_28 {dimension_numbers = #tpu.dot_dimension_numbers<[1], [1], [0], [0], [0, 0, 1, 0], [], []>} : vector<64x8xf32>, vector<64x8xf32>, vector<64x64xf32> -> vector<64x64xf32>
    %cst_29 = arith.constant dense<0xFF800000> : vector<64xf32>
    %56 = vector.multi_reduction <maximumf>, %55, %cst_29 [1] : vector<64x64xf32> to vector<64xf32>
    %57 = vector.shape_cast %56 : vector<64xf32> to vector<64x1xf32>
    %58 = vector.broadcast %57 : vector<64x1xf32> to vector<64x64xf32>
    %59 = arith.subf %55, %58 : vector<64x64xf32>
    %60 = math.exp %59 : vector<64x64xf32>
    %cst_30 = arith.constant dense<0.000000e+00> : vector<64xf32>
    %61 = vector.multi_reduction <add>, %60, %cst_30 [1] : vector<64x64xf32> to vector<64xf32>
    %62 = vector.shape_cast %61 : vector<64xf32> to vector<64x1xf32>
    %63 = vector.broadcast %62 : vector<64x1xf32> to vector<64x64xf32>
    %64 = arith.divf %60, %63 : vector<64x64xf32>
    %cst_31 = arith.constant dense<0.000000e+00> : vector<64x8xf32>
    %65 = tpu.matmul %64, %54, %cst_31 {dimension_numbers = #tpu.dot_dimension_numbers<[1], [0], [0], [1], [0, 0, 1, 1], [], []>} : vector<64x64xf32>, vector<64x8xf32>, vector<64x8xf32> -> vector<64x8xf32>
    %66 = vector.extract_strided_slice %27 {offsets = [8, 0], sizes = [8, 32], strides = [1, 1]} : vector<32x32xf32> to vector<8x32xf32>
    %cst_32 = arith.constant dense<0.000000e+00> : vector<64x32xf32>
    %67 = tpu.matmul %65, %66, %cst_32 {dimension_numbers = #tpu.dot_dimension_numbers<[1], [0], [0], [1], [0, 0, 1, 1], [], []>} : vector<64x8xf32>, vector<8x32xf32>, vector<64x32xf32> -> vector<64x32xf32>
    %68 = arith.addf %49, %67 : vector<64x32xf32>
    %69 = vector.extract_strided_slice %22 {offsets = [0, 16], sizes = [64, 8], strides = [1, 1]} : vector<64x32xf32> to vector<64x8xf32>
    %cst_33 = arith.constant 0.353553385 : f32
    %70 = vector.broadcast %cst_33 : f32 to vector<64x8xf32>
    %71 = arith.mulf %69, %70 : vector<64x8xf32>
    %72 = vector.extract_strided_slice %24 {offsets = [0, 16], sizes = [64, 8], strides = [1, 1]} : vector<64x32xf32> to vector<64x8xf32>
    %73 = vector.extract_strided_slice %26 {offsets = [0, 16], sizes = [64, 8], strides = [1, 1]} : vector<64x32xf32> to vector<64x8xf32>
    %cst_34 = arith.constant dense<0.000000e+00> : vector<64x64xf32>
    %74 = tpu.matmul %71, %72, %cst_34 {dimension_numbers = #tpu.dot_dimension_numbers<[1], [1], [0], [0], [0, 0, 1, 0], [], []>} : vector<64x8xf32>, vector<64x8xf32>, vector<64x64xf32> -> vector<64x64xf32>
    %cst_35 = arith.constant dense<0xFF800000> : vector<64xf32>
    %75 = vector.multi_reduction <maximumf>, %74, %cst_35 [1] : vector<64x64xf32> to vector<64xf32>
    %76 = vector.shape_cast %75 : vector<64xf32> to vector<64x1xf32>
    %77 = vector.broadcast %76 : vector<64x1xf32> to vector<64x64xf32>
    %78 = arith.subf %74, %77 : vector<64x64xf32>
    %79 = math.exp %78 : vector<64x64xf32>
    %cst_36 = arith.constant dense<0.000000e+00> : vector<64xf32>
    %80 = vector.multi_reduction <add>, %79, %cst_36 [1] : vector<64x64xf32> to vector<64xf32>
    %81 = vector.shape_cast %80 : vector<64xf32> to vector<64x1xf32>
    %82 = vector.broadcast %81 : vector<64x1xf32> to vector<64x64xf32>
    %83 = arith.divf %79, %82 : vector<64x64xf32>
    %cst_37 = arith.constant dense<0.000000e+00> : vector<64x8xf32>
    %84 = tpu.matmul %83, %73, %cst_37 {dimension_numbers = #tpu.dot_dimension_numbers<[1], [0], [0], [1], [0, 0, 1, 1], [], []>} : vector<64x64xf32>, vector<64x8xf32>, vector<64x8xf32> -> vector<64x8xf32>
    %85 = vector.extract_strided_slice %27 {offsets = [16, 0], sizes = [8, 32], strides = [1, 1]} : vector<32x32xf32> to vector<8x32xf32>
    %cst_38 = arith.constant dense<0.000000e+00> : vector<64x32xf32>
    %86 = tpu.matmul %84, %85, %cst_38 {dimension_numbers = #tpu.dot_dimension_numbers<[1], [0], [0], [1], [0, 0, 1, 1], [], []>} : vector<64x8xf32>, vector<8x32xf32>, vector<64x32xf32> -> vector<64x32xf32>
    %87 = arith.addf %68, %86 : vector<64x32xf32>
    %88 = vector.extract_strided_slice %22 {offsets = [0, 24], sizes = [64, 8], strides = [1, 1]} : vector<64x32xf32> to vector<64x8xf32>
    %cst_39 = arith.constant 0.353553385 : f32
    %89 = vector.broadcast %cst_39 : f32 to vector<64x8xf32>
    %90 = arith.mulf %88, %89 : vector<64x8xf32>
    %91 = vector.extract_strided_slice %24 {offsets = [0, 24], sizes = [64, 8], strides = [1, 1]} : vector<64x32xf32> to vector<64x8xf32>
    %92 = vector.extract_strided_slice %26 {offsets = [0, 24], sizes = [64, 8], strides = [1, 1]} : vector<64x32xf32> to vector<64x8xf32>
    %cst_40 = arith.constant dense<0.000000e+00> : vector<64x64xf32>
    %93 = tpu.matmul %90, %91, %cst_40 {dimension_numbers = #tpu.dot_dimension_numbers<[1], [1], [0], [0], [0, 0, 1, 0], [], []>} : vector<64x8xf32>, vector<64x8xf32>, vector<64x64xf32> -> vector<64x64xf32>
    %cst_41 = arith.constant dense<0xFF800000> : vector<64xf32>
    %94 = vector.multi_reduction <maximumf>, %93, %cst_41 [1] : vector<64x64xf32> to vector<64xf32>
    %95 = vector.shape_cast %94 : vector<64xf32> to vector<64x1xf32>
    %96 = vector.broadcast %95 : vector<64x1xf32> to vector<64x64xf32>
    %97 = arith.subf %93, %96 : vector<64x64xf32>
    %98 = math.exp %97 : vector<64x64xf32>
    %cst_42 = arith.constant dense<0.000000e+00> : vector<64xf32>
    %99 = vector.multi_reduction <add>, %98, %cst_42 [1] : vector<64x64xf32> to vector<64xf32>
    %100 = vector.shape_cast %99 : vector<64xf32> to vector<64x1xf32>
    %101 = vector.broadcast %100 : vector<64x1xf32> to vector<64x64xf32>
    %102 = arith.divf %98, %101 : vector<64x64xf32>
    %cst_43 = arith.constant dense<0.000000e+00> : vector<64x8xf32>
    %103 = tpu.matmul %102, %92, %cst_43 {dimension_numbers = #tpu.dot_dimension_numbers<[1], [0], [0], [1], [0, 0, 1, 1], [], []>} : vector<64x64xf32>, vector<64x8xf32>, vector<64x8xf32> -> vector<64x8xf32>
    %104 = vector.extract_strided_slice %27 {offsets = [24, 0], sizes = [8, 32], strides = [1, 1]} : vector<32x32xf32> to vector<8x32xf32>
    %cst_44 = arith.constant dense<0.000000e+00> : vector<64x32xf32>
    %105 = tpu.matmul %103, %104, %cst_44 {dimension_numbers = #tpu.dot_dimension_numbers<[1], [0], [0], [1], [0, 0, 1, 1], [], []>} : vector<64x8xf32>, vector<8x32xf32>, vector<64x32xf32> -> vector<64x32xf32>
    %106 = arith.addf %87, %105 : vector<64x32xf32>
    %c0_45 = arith.constant 0 : index
    %c0_46 = arith.constant 0 : index
    %c0_47 = arith.constant 0 : index
    %107 = vector.load %arg8[%c0_45, %c0_46, %c0_47] : memref<1x64x32xf32, #tpu.memory_space<vmem>>, vector<1x64x32xf32>
    %108 = vector.shape_cast %107 : vector<1x64x32xf32> to vector<64x32xf32>
    %109 = vector.shape_cast %106 : vector<64x32xf32> to vector<1x64x32xf32>
    tpu.vector_store %arg8[%c0_45, %c0_46, %c0_47], %109 {strides = array<i32>} : memref<1x64x32xf32, #tpu.memory_space<vmem>>, vector<1x64x32xf32>,
    return
  }
  func.func @transform_0(%arg0: i32) -> (i32, i32, i32) {
    %c0_i32 = arith.constant 0 : i32
    %c0_i32_0 = arith.constant 0 : i32
    %c0_i32_1 = arith.constant 0 : i32
    return %arg0, %c0_i32, %c0_i32_0 : i32, i32, i32
  }
  func.func @transform_1(%arg0: i32) -> (i32, i32) {
    %c0_i32 = arith.constant 0 : i32
    %c0_i32_0 = arith.constant 0 : i32
    %c0_i32_1 = arith.constant 0 : i32
    return %c0_i32, %c0_i32_0 : i32, i32
  }
  func.func @transform_2(%arg0: i32) -> (i32, i32) {
    %c0_i32 = arith.constant 0 : i32
    %c0_i32_0 = arith.constant 0 : i32
    %c0_i32_1 = arith.constant 0 : i32
    return %c0_i32, %c0_i32_0 : i32, i32
  }
  func.func @transform_3(%arg0: i32) -> (i32, i32) {
    %c0_i32 = arith.constant 0 : i32
    %c0_i32_0 = arith.constant 0 : i32
    %c0_i32_1 = arith.constant 0 : i32
    return %c0_i32, %c0_i32_0 : i32, i32
  }
  func.func @transform_4(%arg0: i32) -> (i32, i32) {
    %c0_i32 = arith.constant 0 : i32
    %c0_i32_0 = arith.constant 0 : i32
    %c0_i32_1 = arith.constant 0 : i32
    return %c0_i32, %c0_i32_0 : i32, i32
  }
  func.func @transform_5(%arg0: i32) -> (i32, i32) {
    %c0_i32 = arith.constant 0 : i32
    %c0_i32_0 = arith.constant 0 : i32
    %c0_i32_1 = arith.constant 0 : i32
    return %c0_i32, %c0_i32_0 : i32, i32
  }
  func.func @transform_6(%arg0: i32) -> (i32, i32) {
    %c0_i32 = arith.constant 0 : i32
    %c0_i32_0 = arith.constant 0 : i32
    %c0_i32_1 = arith.constant 0 : i32
    return %c0_i32, %c0_i32_0 : i32, i32
  }
  func.func @transform_7(%arg0: i32) -> (i32, i32, i32) {
    %c0_i32 = arith.constant 0 : i32
    %c0_i32_0 = arith.constant 0 : i32
    %c0_i32_1 = arith.constant 0 : i32
    return %arg0, %c0_i32, %c0_i32_0 : i32, i32, i32
  }
}

</mosaic_0001>

<bundles_post_ra>
// kernel: tpu_custom_call.1
= control target key start
LH: loop header
LB: loop body
LE: loop exit
PB: predicated region body
PF: predicated region fallthrough
CT: control target
= control target key end

     0   :  { %s4260_s24 = smov 0   ;;  %s5084_s0 = inlined_call_operand.vmem [shape: f32[2,64,32], index: 0, kind: input, shape index: {}]   ;;  %s5085_s1 = inlined_call_operand.vmem [shape: f32[1,32], index: 1, kind: input, shape index: {}]   ;;  %s5086_s2 = inlined_call_operand.vmem [shape: f32[32,32], index: 2, kind: input, shape index: {}]   ;;  %s5087_s3 = inlined_call_operand.vmem [shape: f32[32,32], index: 3, kind: input, shape index: {}]   ;;  %s5088_s4 = inlined_call_operand.vmem [shape: f32[32,32], index: 4, kind: input, shape index: {}]   ;;  %s5089_s5 = inlined_call_operand.vmem [shape: f32[32,32], index: 5, kind: input, shape index: {}]   ;;  %s5090_s6 = inlined_call_operand.vmem [shape: f32[1,32], index: 6, kind: input, shape index: {}]   ;;  %s5091_s7 = inlined_call_operand.vmem [shape: f32[2,64,32], index: 7, kind: output, shape index: {}]  }
   0x1 LB: > { %s3007_s25 = sadd.s32 4294967295, %s4215_s24   ;;  %p3011_p0 = scmp.ge.s32.totalorder %s4215_s24, 1  ;;  %s4215_s24 = sphi %s4260_s24, %s17_s24  }
   0x2   : > { %p237_p1 = scmp.lt.s32.totalorder %s4215_s24, 3 }
   0x4   : > { %p238_p2 = pnand %p3011_p0, %p237_p1 }
   0x5   : > { %p269_p3 = scmp.lt.s32.totalorder (!%p238_p2), %s3007_s25, 1  ;;  %vm288_vm0 = vcmask (!%p238_p2), 261120   ;;  %v408_v56 = vld [vmem:[%s5086_s2] sm:$0xff] (!%p238_p2)  ;;  %v409_v57 = vld [vmem:[%s5086_s2 + $0x8] sm:$0xff] (!%p238_p2)  ;;  %v410_v59 = vld [vmem:[%s5086_s2 + $0x10] sm:$0xff] (!%p238_p2)  ;;  %vm786_vm1 = vcmask (!%p238_p2), 64512  }
   0x6   : > { %241 = sbr.rel (%p238_p2) target bundleno = 2388 (0x954), region = 48  ;;  %v3714_v58 = vpack.c.bf16 (!%p238_p2), %v409_v57, %v408_v56  ;;  %v411_v60 = vld [vmem:[%s5086_s2 + $0x18] sm:$0xff] (!%p238_p2)  ;;  %v541_v62 = vld [vmem:[%s5087_s3] sm:$0xff] (!%p238_p2)  ;;  %v542_v63 = vld [vmem:[%s5087_s3 + $0x8] sm:$0xff] (!%p238_p2)  ;;  %s4217_s13 = smov (!%p238_p2), 120   ;;  %vm940_vm3 = vcmask (!%p238_p2), 523264  }
   0x7   : > { %v3718_v61 = vpack.c.bf16 (!%p238_p2), %v411_v60, %v410_v59  ;;  %vm4445_vm2 = vmpackc.low (!%p238_p2), %vm786_vm1, %vm786_vm1  ;;  %s4218_s14 = smov (!%p238_p2), 112   ;;  %s4219_s17 = smov (!%p238_p2), 104  }
   0x8   : > { %3898 = vmatprep.subr.bf16.mxu1 (!%p238_p2), %v3714_v58  ;;  %3715 = vmatprep.subr.bf16.mxu0 (!%p238_p2), %v3714_v58 }
   0x9   : > { %3900 = vmatpush3.bf16.msra.mxu1 (!%p238_p2), %v3714_v58  ;;  %3717 = vmatpush3.bf16.msra.mxu0 (!%p238_p2), %v3714_v58 }
   0xa   : > { %3899 = vmatprep.subr.bf16.mxu1 (!%p238_p2), %v3718_v61  ;;  %3719 = vmatprep.subr.bf16.mxu0 (!%p238_p2), %v3718_v61 }
   0xd   : > { %s5095_s25 = smov (!%p269_p3, %s3007_s25), 1  ;;  %3901 = vmatpush3.bf16.msra.mxu1 %v3718_v61  ;;  %3721 = vmatpush3.bf16.msra.mxu0 %v3718_v61 }
   0xe   : > { %s3172_s26 = sshll.u32 %s5095_s25, 6 }
   0xf   : > { %s273_s29 = scalar_lea.vmem %s5084_s0, %s3172_s26  ;;  %s5056_s8 = scalar_lea.vmem %s5091_s7, %s3172_s26 }
  0x10   : > { %v283_v0 = vld [vmem:[%s273_s29 + $0x20] sm:$0xff]  ;;  %v285_v1 = vld [vmem:[%s273_s29 + $0x30] sm:$0xff]  ;;  %v284_v2 = vld [vmem:[%s273_s29 + $0x28] sm:$0xff] }
  0x11   : > { %v301_v3 = vsel %vm288_vm0, %v283_v0, 0.0  ;;  %v307_v4 = vsel %vm288_vm0, %v285_v1, 0.0  ;;  %v286_v5 = vld [vmem:[%s273_s29 + $0x38] sm:$0xff]  ;;  %v304_v6 = vsel %vm288_vm0, %v284_v2, 0.0  ;;  %v279_v8 = vld [vmem:[%s273_s29] sm:$0xff]  ;;  %v280_v9 = vld [vmem:[%s273_s29 + $0x8] sm:$0xff] }
  0x12   : > { %302 = vadd.xlane.f32.xlu0 %v301_v3  ;;  %308 = vadd.xlane.f32.xlu1 %v307_v4  ;;  %v310_v7 = vsel %vm288_vm0, %v286_v5, 0.0  ;;  %v289_v10 = vsel %vm288_vm0, %v279_v8, 0.0  ;;  %v292_v11 = vsel %vm288_vm0, %v280_v9, 0.0  ;;  %v281_v12 = vld [vmem:[%s273_s29 + $0x10] sm:$0xff]  ;;  %v282_v13 = vld [vmem:[%s273_s29 + $0x18] sm:$0xff] }
  0x13   : > { %v295_v14 = vsel %vm288_vm0, %v281_v12, 0.0  ;;  %v298_v15 = vsel %vm288_vm0, %v282_v13, 0.0 }
  0x16   : > { %305 = vadd.xlane.f32.xlu0 %v304_v6  ;;  %311 = vadd.xlane.f32.xlu1 %v310_v7 }
  0x1a   : > { %290 = vadd.xlane.f32.xlu0 %v289_v10  ;;  %293 = vadd.xlane.f32.xlu1 %v292_v11 }
  0x1e   : > { %296 = vadd.xlane.f32.xlu0 %v295_v14  ;;  %299 = vadd.xlane.f32.xlu1 %v298_v15 }
  0x9f   : > { %v303_v16 = vpop.xlane.xlu0 %302  ;;  %v309_v17 = vpop.xlane.xlu1 %308 }
  0xa0   : > { %v318_v18 = vmul.f32 0.03125, %v303_v16  ;;  %v320_v19 = vmul.f32 0.03125, %v309_v17 }
  0xa2   : > { %v4284_v20 = vsub.f32 %v283_v0, %v318_v18  ;;  %v4286_v21 = vsub.f32 %v285_v1, %v320_v19  ;;  %v3722_v0 = vpack.c.bf16 %v542_v63, %v541_v62  ;;  %v650_v1 = vld [vmem:[%s5088_s4] sm:$0xff] }
  0xa3   : > { %v306_v22 = vpop.xlane.xlu0 %305  ;;  %v312_v23 = vpop.xlane.xlu1 %311 }
  0xa4   : > { %v319_v24 = vmul.f32 0.03125, %v306_v22  ;;  %v321_v25 = vmul.f32 0.03125, %v312_v23  ;;  %v334_v26 = vmul.f32 %v4284_v20, %v4284_v20  ;;  %v336_v27 = vmul.f32 %v4286_v21, %v4286_v21  ;;  %3723 = vmatprep.subr.bf16.mxu1 %v3722_v0 }
  0xa6   : > { %v4292_v28 = vsub.f32 %v284_v2, %v319_v24  ;;  %v4294_v29 = vsub.f32 %v286_v5, %v321_v25  ;;  %v350_v30 = vsel %vm288_vm0, %v334_v26, 0.0  ;;  %v356_v33 = vsel %vm288_vm0, %v336_v27, 0.0  ;;  %v651_v2 = vld [vmem:[%s5088_s4 + $0x8] sm:$0xff] }
  0xa7   : > { %351 = vadd.xlane.f32.xlu0 %v350_v30  ;;  %v291_v31 = vpop.xlane.xlu0 %290  ;;  %v294_v32 = vpop.xlane.xlu1 %293  ;;  %v4348_v3 = vpack.c.bf16 %v651_v2, %v650_v1  ;;  %v3016_v30 = vld [vmem:[%s5085_s1] ss:$0 sm:$0xff] }
  0xa8   : > { %v314_v34 = vmul.f32 0.03125, %v291_v31  ;;  %v335_v35 = vmul.f32 %v4292_v28, %v4292_v28  ;;  %v315_v36 = vmul.f32 0.03125, %v294_v32  ;;  %v337_v37 = vmul.f32 %v4294_v29, %v4294_v29 }
  0xa9   : > { %3731 = vmatprep.subr.bf16.mxu0 %v4348_v3 }
  0xaa   : > { %v4302_v38 = vsub.f32 %v279_v8, %v314_v34  ;;  %v353_v39 = vsel %vm288_vm0, %v335_v35, 0.0  ;;  %v4305_v40 = vsub.f32 %v280_v9, %v315_v36  ;;  %v359_v42 = vsel %vm288_vm0, %v337_v37, 0.0  ;;  %v543_v37 = vld [vmem:[%s5087_s3 + $0x10] sm:$0xff] }
  0xab   : > { %354 = vadd.xlane.f32.xlu1 %v353_v39  ;;  %357 = vadd.xlane.f32.xlu0 %v356_v33  ;;  %v297_v41 = vpop.xlane.xlu0 %296  ;;  %v300_v43 = vpop.xlane.xlu1 %299  ;;  %v544_v39 = vld [vmem:[%s5087_s3 + $0x18] sm:$0xff] }
  0xac   : > { %v316_v44 = vmul.f32 0.03125, %v297_v41  ;;  %v317_v45 = vmul.f32 0.03125, %v300_v43  ;;  %v330_v46 = vmul.f32 %v4302_v38, %v4302_v38  ;;  %v331_v47 = vmul.f32 %v4305_v40, %v4305_v40 }
  0xae   : > { %v4312_v48 = vsub.f32 %v281_v12, %v316_v44  ;;  %v4314_v49 = vsub.f32 %v282_v13, %v317_v45  ;;  %v338_v50 = vsel %vm288_vm0, %v330_v46, 0.0  ;;  %v341_v51 = vsel %vm288_vm0, %v331_v47, 0.0 }
  0xaf   : > { %360 = vadd.xlane.f32.xlu1 %v359_v42  ;;  %339 = vadd.xlane.f32.xlu0 %v338_v50  ;;  %v3726_v44 = vpack.c.bf16 %v544_v39, %v543_v37 }
  0xb0   : > { %v332_v52 = vmul.f32 %v4312_v48, %v4312_v48  ;;  %v333_v53 = vmul.f32 %v4314_v49, %v4314_v49 }
  0xb2   : > { %v344_v54 = vsel %vm288_vm0, %v332_v52, 0.0  ;;  %v347_v55 = vsel %vm288_vm0, %v333_v53, 0.0 }
  0xb3   : > { %342 = vadd.xlane.f32.xlu1 %v341_v51  ;;  %345 = vadd.xlane.f32.xlu0 %v344_v54 }
  0xb7   : > { %348 = vadd.xlane.f32.xlu1 %v347_v55 }
 0x134   : > { %v352_v4 = vpop.xlane.xlu0 %351 }
 0x135   : > { %v366_v5 = vmul.f32 0.03125, %v352_v4 }
 0x137   : > { %v374_v6 = vadd.f32 1e-05, %v366_v5 }
 0x138   : > { %v355_v7 = vpop.xlane.xlu1 %354  ;;  %v358_v8 = vpop.xlane.xlu0 %357 }
 0x139   : > { %4065 = vrsqrt.f32 %v374_v6  ;;  %v367_v9 = vmul.f32 0.03125, %v355_v7  ;;  %v368_v10 = vmul.f32 0.03125, %v358_v8 }
 0x13b   : > { %v375_v11 = vadd.f32 1e-05, %v367_v9  ;;  %v376_v12 = vadd.f32 1e-05, %v368_v10 }
 0x13c   : > { %v361_v13 = vpop.xlane.xlu1 %360  ;;  %v340_v14 = vpop.xlane.xlu0 %339 }
 0x13d   : > { %4067 = vrsqrt.f32 %v375_v11  ;;  %v369_v15 = vmul.f32 0.03125, %v361_v13  ;;  %v362_v16 = vmul.f32 0.03125, %v340_v14 }
 0x13e   : > { %4069 = vrsqrt.f32 %v376_v12 }
 0x13f   : > { %v377_v17 = vadd.f32 1e-05, %v369_v15  ;;  %v370_v18 = vadd.f32 1e-05, %v362_v16 }
 0x140   : > { %v343_v19 = vpop.xlane.xlu1 %342  ;;  %v346_v22 = vpop.xlane.xlu0 %345 }
 0x141   : > { %4071 = vrsqrt.f32 %v377_v17  ;;  %v363_v23 = vmul.f32 0.03125, %v343_v19  ;;  %v364_v24 = vmul.f32 0.03125, %v346_v22 }
 0x142   : > { %4073 = vrsqrt.f32 %v370_v18 }
 0x143   : > { %v4066_v25 = vpop.eup %4065  ;;  %v371_v26 = vadd.f32 1e-05, %v363_v23  ;;  %v372_v27 = vadd.f32 1e-05, %v364_v24 }
 0x144   : > { %v349_v31 = vpop.xlane.xlu1 %348  ;;  %v390_v32 = vmul.f32 %v4066_v25, %v4284_v20 }
 0x145   : > { %4075 = vrsqrt.f32 %v371_v26  ;;  %v365_v33 = vmul.f32 0.03125, %v349_v31 }
 0x146   : > { %4077 = vrsqrt.f32 %v372_v27  ;;  %v4355_v34 = vmul.f32 %v3016_v30, %v390_v32 }
 0x147   : > { %v4068_v35 = vpop.eup %4067  ;;  %v373_v36 = vadd.f32 1e-05, %v365_v33 }
 0x148   : > { %v4070_v41 = vpop.eup %4069  ;;  %3388 = vmatprep.mubr.msk.f32.mxu1 %vm288_vm0, %v4355_v34  ;;  %v391_v20 = vmul.f32 %v4068_v35, %v4292_v28 }
 0x149   : > { %4079 = vrsqrt.f32 %v373_v36  ;;  %v392_v42 = vmul.f32 %v4070_v41, %v4286_v21 }
 0x14a   : > { %v4367_v43 = vmul.f32 %v3016_v30, %v391_v20 }
 0x14b   : > { %v4072_v45 = vpop.eup %4071  ;;  %v4369_v46 = vmul.f32 %v3016_v30, %v392_v42 }
 0x14c   : > { %v4074_v47 = vpop.eup %4073  ;;  %3389 = vmatmul.mubr.msk.f32.vlgmr.msra.gmra.mrb[0].mxu1 %vm288_vm0, %v4367_v43  ;;  %v393_v50 = vmul.f32 %v4072_v45, %v4294_v29  ;;  %v652_v29 = vld [vmem:[%s5088_s4 + $0x10] sm:$0xff] }
 0x14d   : > { %3391 = vmatprep.mubr.msk.f32.mxu1 %vm288_vm0, %v4369_v46  ;;  %3725 = vmatpush3.bf16.msra.mxu1 %v3722_v0  ;;  %v386_v28 = vmul.f32 %v4074_v47, %v4302_v38  ;;  %v653_v38 = vld [vmem:[%s5088_s4 + $0x18] sm:$0xff] }
 0x14e   : > { %v4377_v51 = vmul.f32 %v3016_v30, %v393_v50  ;;  %3727 = vmatprep.subr.bf16.mxu1 %v3726_v44  ;;  %v3734_v58 = vpack.c.bf16 %v653_v38, %v652_v29 }
 0x14f   : > { %v4076_v21 = vpop.eup %4075  ;;  %v4379_v52 = vmul.f32 %v3016_v30, %v386_v28 }
 0x150   : > { %v4078_v53 = vpop.eup %4077  ;;  %3392 = vmatmul.mubr.msk.f32.gmra.mrb[2].mxu1 %vm288_vm0, %v4377_v51  ;;  %v387_v54 = vmul.f32 %v4076_v21, %v4305_v40 }
 0x151   : > { %3382 = vmatprep.mubr.msk.f32.mxu0 %vm288_vm0, %v4379_v52  ;;  %3729 = vmatpush3.bf16.msra.mxu1 %v3726_v44  ;;  %v388_v55 = vmul.f32 %v4078_v53, %v4312_v48 }
 0x152   : > { %3402 = vmatprep.mubr.msk.f32.mxu1 %vm288_vm0, %v4379_v52  ;;  %v4395_v56 = vmul.f32 %v3016_v30, %v387_v54 }
 0x153   : > { %v4080_v40 = vpop.eup %4079  ;;  %v4397_v57 = vmul.f32 %v3016_v30, %v388_v55 }
 0x154   : > { %3383 = vmatmul.mubr.msk.f32.vlgmr.msra.gmra.mrb[0].mxu0 %vm288_vm0, %v4395_v56  ;;  %3403 = vmatmul.mubr.msk.f32.vlgmr.msra.gmra.mrb[4].mxu1 %vm288_vm0, %v4395_v56  ;;  %v389_v59 = vmul.f32 %v4080_v40, %v4314_v49 }
 0x155   : > { %3385 = vmatprep.mubr.msk.f32.mxu0 %vm288_vm0, %v4397_v57  ;;  %3405 = vmatprep.mubr.msk.f32.mxu1 %vm288_vm0, %v4397_v57 }
 0x156   : > { %3733 = vmatpush3.bf16.msra.mxu0 %v4348_v3  ;;  %v4409_v48 = vmul.f32 %v3016_v30, %v389_v59  ;;  %v760_v3 = vld [vmem:[%s5089_s5 + $0x8] sm:$0xff] }
 0x157   : > { %3735 = vmatprep.subr.bf16.mxu0 %v3734_v58 }
 0x158   : > { %3386 = vmatmul.mubr.msk.f32.gmra.mrb[2].mxu0 %vm288_vm0, %v4409_v48  ;;  %3406 = vmatmul.mubr.msk.f32.gmra.mrb[6].mxu1 %vm288_vm0, %v4409_v48 }
 0x159   : > { %3408 = vmatprep.mubr.msk.f32.mxu1 %vm288_vm0, %v4355_v34  ;;  %3422 = vmatprep.mubr.msk.f32.mxu0 %vm288_vm0, %v4379_v52 }
 0x15a   : > { %3737 = vmatpush3.bf16.msra.mxu0 %v3734_v58 }
 0x15c   : > { %3409 = vmatmul.mubr.msk.f32.gmra.mrb[8].mxu1 %vm288_vm0, %v4367_v43 }
 0x15d   : > { %3423 = vmatmul.mubr.msk.f32.vlgmr.msra.gmra.mrb[4].mxu0 %vm288_vm0, %v4395_v56  ;;  %3411 = vmatprep.mubr.msk.f32.mxu1 %vm288_vm0, %v4369_v46 }
 0x15e   : > { %3425 = vmatprep.mubr.msk.f32.mxu0 %vm288_vm0, %v4397_v57 }
 0x160   : > { %3412 = vmatmul.mubr.msk.f32.gmra.mrb[10].mxu1 %vm288_vm0, %v4377_v51 }
 0x161   : > { %3426 = vmatmul.mubr.msk.f32.gmra.mrb[6].mxu0 %vm288_vm0, %v4409_v48 }
 0x162   : > { %3428 = vmatprep.mubr.msk.f32.mxu0 %vm288_vm0, %v4355_v34 }
 0x165   : > { %3429 = vmatmul.mubr.msk.f32.gmra.mrb[8].mxu0 %vm288_vm0, %v4367_v43 }
 0x166   : > { %3431 = vmatprep.mubr.msk.f32.mxu0 %vm288_vm0, %v4369_v46 }
 0x169   : > { %3432 = vmatmul.mubr.msk.f32.gmra.mrb[10].mxu0 %vm288_vm0, %v4377_v51 }
 0x21f   : > { %v4439_v49 = vpop.f32.mrb[0].mxu1 }
 0x220   : > { %v522_v60 = vpop.f32.mrb[1].mxu1  ;;  %v4514_v21 = vmul.f32 0.35355338, %v4439_v49 }
 0x221   : > { %v4481_v27 = vmul.f32 0.35355338, %v522_v60 }
 0x223   : > { %v4441_v61 = vpop.f32.mrb[2].mxu1 }
 0x224   : > { %v532_v62 = vpop.f32.mrb[3].mxu1  ;;  %v4521_v53 = vmul.f32 0.35355338, %v4441_v61 }
 0x225   : > { %v4493_v37 = vmul.f32 0.35355338, %v532_v62 }
 0x227   : > { %v3384_v63 = vpop.f32.mrb[0].mxu0  ;;  %v3404_v0 = vpop.f32.mrb[4].mxu1 }
 0x228   : > { %v502_v1 = vpop.f32.mrb[1].mxu0  ;;  %v611_v2 = vpop.f32.mrb[5].mxu1  ;;  %v4495_v39 = vmul.f32 0.35355338, %v3384_v63 }
 0x229   : > { %v4449_v4 = vmul.f32 0.35355338, %v502_v1  ;;  %v3738_v5 = vpack.c.bf16 %v3404_v0, %v611_v2  ;;  %v4451_v6 = vpack.i.bf16 %v3404_v0, %v611_v2 }
 0x22b   : > { %3946 = vrot.lane.b32.xlu0 %v4451_v6, %s4217_s13  ;;  %v3387_v7 = vpop.f32.mrb[2].mxu0  ;;  %v3407_v8 = vpop.f32.mrb[6].mxu1  ;;  %3740 = vmatprep.subr.msk.bf16.mxu1 %vm4445_vm2, %v3738_v5 }
 0x22c   : > { %3450 = vmatprep.mubr.msk.f32.mxu1 %vm786_vm1, %v4449_v4  ;;  %v512_v9 = vpop.f32.mrb[3].mxu0  ;;  %v621_v10 = vpop.f32.mrb[7].mxu1  ;;  %3743 = vmatpush3.bf16.xpose.msk.msra.mxu1 %vm4445_vm2, %v3738_v5  ;;  %v4505_v45 = vmul.f32 0.35355338, %v3387_v7 }
 0x22d   : > { %v3744_v11 = vpack.c.bf16 %v3407_v8, %v621_v10  ;;  %v4461_v12 = vpack.i.bf16 %v3407_v8, %v621_v10  ;;  %v4467_v14 = vmul.f32 0.35355338, %v512_v9 }
 0x22f   : > { %1295 = vrot.lane.b32.xlu0 %v4449_v4, %s4217_s13  ;;  %3951 = vrot.lane.b32.xlu1 %v4461_v12, %s4217_s13  ;;  %v3410_v13 = vpop.f32.mrb[8].mxu1 }
 0x230   : > { %v3424_v15 = vpop.f32.mrb[4].mxu0  ;;  %3746 = vmatprep.subr.msk.bf16.mxu1 %vm4445_vm2, %v3744_v11  ;;  %v631_v16 = vpop.f32.mrb[9].mxu1 }
 0x231   : > { %v3750_v17 = vpack.c.bf16 %v3410_v13, %v631_v16  ;;  %v720_v18 = vpop.f32.mrb[5].mxu0  ;;  %v4471_v19 = vpack.i.bf16 %v3410_v13, %v631_v16 }
 0x232   : > { %v4473_v22 = vpack.i.bf16 %v3424_v15, %v720_v18  ;;  %v3762_v23 = vpack.c.bf16 %v3424_v15, %v720_v18 }
 0x233   : > { %3956 = vrot.lane.b32.xlu1 %v4471_v19, %s4217_s13  ;;  %v3413_v24 = vpop.f32.mrb[10].mxu1  ;;  %1299 = vrot.lane.b32.xlu0 %v4467_v14, %s4217_s13 }
 0x234   : > { %v3427_v25 = vpop.f32.mrb[6].mxu0  ;;  %3763 = vmatprep.subr.bf16.mxu0 %v3762_v23  ;;  %v641_v26 = vpop.f32.mrb[11].mxu1  ;;  %3749 = vmatpush3.bf16.xpose.msk.msra.mxu1 %vm4445_vm2, %v3744_v11 }
 0x235   : > { %v3756_v30 = vpack.c.bf16 %v3413_v24, %v641_v26  ;;  %v730_v31 = vpop.f32.mrb[7].mxu0  ;;  %3765 = vmatpush3.bf16.msra.mxu0 %v3762_v23  ;;  %3752 = vmatprep.subr.msk.bf16.mxu1 %vm4445_vm2, %v3750_v17  ;;  %v4485_v32 = vpack.i.bf16 %v3413_v24, %v641_v26 }
 0x236   : > { %v4487_v33 = vpack.i.bf16 %v3427_v25, %v730_v31  ;;  %v3766_v35 = vpack.c.bf16 %v3427_v25, %v730_v31 }
 0x237   : > { %3961 = vrot.lane.b32.xlu1 %v4485_v32, %s4217_s13  ;;  %1303 = vrot.lane.b32.xlu0 %v4481_v27, %s4217_s13 }
 0x238   : > { %v3430_v36 = vpop.f32.mrb[8].mxu0  ;;  %3767 = vmatprep.subr.bf16.mxu0 %v3766_v35 }
 0x239   : > { %v740_v41 = vpop.f32.mrb[9].mxu0  ;;  %3769 = vmatpush3.bf16.msra.mxu0 %v3766_v35 }
 0x23a   : > { %v4497_v20 = vpack.i.bf16 %v3430_v36, %v740_v41  ;;  %v3770_v42 = vpack.c.bf16 %v3430_v36, %v740_v41 }
 0x23b   : > { %1297 = vrot.lane.b32.xlu1 %v4495_v39, %s4217_s13  ;;  %1307 = vrot.lane.b32.xlu0 %v4493_v37, %s4217_s13 }
 0x23c   : > { %v3433_v44 = vpop.f32.mrb[10].mxu0  ;;  %3771 = vmatprep.subr.bf16.mxu0 %v3770_v42  ;;  %3755 = vmatpush3.bf16.xpose.msk.msra.mxu1 %vm4445_vm2, %v3750_v17 }
 0x23d   : > { %v750_v47 = vpop.f32.mrb[11].mxu0  ;;  %3773 = vmatpush3.bf16.msra.mxu0 %v3770_v42  ;;  %3758 = vmatprep.subr.msk.bf16.mxu1 %vm4445_vm2, %v3756_v30 }
 0x23e   : > { %v4509_v50 = vpack.i.bf16 %v3433_v44, %v750_v47  ;;  %v3774_v28 = vpack.c.bf16 %v3433_v44, %v750_v47 }
 0x23f   : > { %1301 = vrot.lane.b32.xlu1 %v4505_v45, %s4217_s13 }
 0x240   : > { %3775 = vmatprep.subr.bf16.mxu0 %v3774_v28 }
 0x241   : > { %3777 = vmatpush3.bf16.msra.mxu0 %v3774_v28 }
 0x243   : > { %1305 = vrot.lane.b32.xlu1 %v4514_v21, %s4217_s13 }
 0x244   : > { %3761 = vmatpush3.bf16.xpose.msk.msra.mxu1 %vm4445_vm2, %v3756_v30 }
 0x247   : > { %1309 = vrot.lane.b32.xlu1 %v4521_v53, %s4217_s13 }
 0x24b   : > { %3451 = vmatmul.mubr.msk.f32.vlgmr.msra.gmra.mrb[12].mxu1 %vm786_vm1, %v4495_v39 }
 0x24c   : > { %3453 = vmatprep.mubr.msk.f32.mxu1 %vm786_vm1, %v4467_v14 }
 0x24f   : > { %3454 = vmatmul.mubr.msk.f32.gmra.mrb[14].mxu1 %vm786_vm1, %v4505_v45 }
 0x250   : > { %3456 = vmatprep.mubr.msk.f32.mxu1 %vm786_vm1, %v4481_v27 }
 0x253   : > { %3457 = vmatmul.mubr.msk.f32.gmra.mrb[16].mxu1 %vm786_vm1, %v4514_v21 }
 0x254   : > { %3459 = vmatprep.mubr.msk.f32.mxu1 %vm786_vm1, %v4493_v37 }
 0x257   : > { %3460 = vmatmul.mubr.msk.f32.gmra.mrb[18].mxu1 %vm786_vm1, %v4521_v53 }
 0x29d   : > { %v3947_v54 = vpop.permute.xlu0 %3946 }
 0x29e   : > { %v3949_v29 = vunpack.i.h.bf16 %v3947_v54  ;;  %v3948_v38 = vunpack.i.l.bf16 %v3947_v54 }
 0x2a0   : > { %v3778_v55 = vpack.c.bf16 %v3949_v29, %v3948_v38 }
 0x2a1   : > { %v3952_v40 = vpop.permute.xlu1 %3951  ;;  %v1296_v58 = vpop.permute.xlu0 %1295 }
 0x2a2   : > { %v3954_v59 = vunpack.i.h.bf16 %v3952_v40  ;;  %v3953_v49 = vunpack.i.l.bf16 %v3952_v40  ;;  %3780 = vmatprep.subr.msk.bf16.mxu1 %vm4445_vm2, %v3778_v55  ;;  %3520 = vmatprep.mubr.msk.f32.mxu1 %vm786_vm1, %v1296_v58 }
 0x2a3   : > { %3783 = vmatpush3.bf16.xpose.msk.msra.mxu1 %vm4445_vm2, %v3778_v55 }
 0x2a4   : > { %v3784_v60 = vpack.c.bf16 %v3954_v59, %v3953_v49 }
 0x2a5   : > { %v3957_v61 = vpop.permute.xlu1 %3956  ;;  %v1300_v9 = vpop.permute.xlu0 %1299 }
 0x2a6   : > { %v3959_v62 = vunpack.i.h.bf16 %v3957_v61  ;;  %v3958_v63 = vunpack.i.l.bf16 %v3957_v61  ;;  %3786 = vmatprep.subr.msk.bf16.mxu1 %vm4445_vm2, %v3784_v60 }
 0x2a8   : > { %v3790_v0 = vpack.c.bf16 %v3959_v62, %v3958_v63 }
 0x2a9   : > { %v3962_v1 = vpop.permute.xlu1 %3961  ;;  %v1304_v11 = vpop.permute.xlu0 %1303 }
 0x2aa   : > { %v3964_v2 = vunpack.i.h.bf16 %v3962_v1  ;;  %v3963_v5 = vunpack.i.l.bf16 %v3962_v1 }
 0x2ab   : > { %3789 = vmatpush3.bf16.xpose.msk.msra.mxu1 %vm4445_vm2, %v3784_v60 }
 0x2ac   : > { %3792 = vmatprep.subr.msk.bf16.mxu1 %vm4445_vm2, %v3790_v0  ;;  %v3796_v7 = vpack.c.bf16 %v3964_v2, %v3963_v5 }
 0x2ad   : > { %v1298_v8 = vpop.permute.xlu1 %1297  ;;  %v1308_v15 = vpop.permute.xlu0 %1307 }
 0x2b1   : > { %v1302_v10 = vpop.permute.xlu1 %1301 }
 0x2b3   : > { %3795 = vmatpush3.bf16.xpose.msk.msra.mxu1 %vm4445_vm2, %v3790_v0 }
 0x2b4   : > { %3798 = vmatprep.subr.msk.bf16.mxu1 %vm4445_vm2, %v3796_v7 }
 0x2b5   : > { %v1306_v13 = vpop.permute.xlu1 %1305 }
 0x2b9   : > { %v1310_v16 = vpop.permute.xlu1 %1309 }
 0x2bb   : > { %3801 = vmatpush3.bf16.xpose.msk.msra.mxu1 %vm4445_vm2, %v3796_v7 }
 0x2c2   : > { %3521 = vmatmul.mubr.msk.f32.vlgmr.msra.gmra.mrb[20].mxu1 %vm786_vm1, %v1298_v8 }
 0x2c3   : > { %3523 = vmatprep.mubr.msk.f32.mxu1 %vm786_vm1, %v1300_v9 }
 0x2c6   : > { %3524 = vmatmul.mubr.msk.f32.gmra.mrb[22].mxu1 %vm786_vm1, %v1302_v10 }
 0x2c7   : > { %3526 = vmatprep.mubr.msk.f32.mxu1 %vm786_vm1, %v1304_v11 }
 0x2ca   : > { %3527 = vmatmul.mubr.msk.f32.gmra.mrb[24].mxu1 %vm786_vm1, %v1306_v13 }
 0x2cb   : > { %3529 = vmatprep.mubr.msk.f32.mxu1 %vm786_vm1, %v1308_v15 }
 0x2ce   : > { %3530 = vmatmul.mubr.msk.f32.gmra.mrb[26].mxu1 %vm786_vm1, %v1310_v16 }
 0x31e   : > { %v3452_v17 = vpop.f32.mrb[12].mxu1 }
 0x31f   : > { %v901_v18 = vpop.f32.mrb[13].mxu1  ;;  %v944_v23 = vsel %vm940_vm3, %v3452_v17, -inf }
 0x320   : > { %945 = vmax.xlane.f32.xlu1 %v944_v23  ;;  %v941_v24 = vsel %vm940_vm3, %v901_v18, -inf }
 0x321   : > { %942 = vmax.xlane.f32.xlu0 %v941_v24 }
 0x322   : > { %v3455_v25 = vpop.f32.mrb[14].mxu1 }
 0x323   : > { %v911_v26 = vpop.f32.mrb[15].mxu1  ;;  %v950_v30 = vsel %vm940_vm3, %v3455_v25, -inf }
 0x324   : > { %v947_v41 = vsel %vm940_vm3, %v911_v26, -inf }
 0x325   : > { %951 = vmax.xlane.f32.xlu0 %v950_v30 }
 0x326   : > { %v3458_v31 = vpop.f32.mrb[16].mxu1 }
 0x327   : > { %v921_v35 = vpop.f32.mrb[17].mxu1  ;;  %v956_v36 = vsel %vm940_vm3, %v3458_v31, -inf }
 0x328   : > { %957 = vmax.xlane.f32.xlu1 %v956_v36  ;;  %v953_v28 = vsel %vm940_vm3, %v921_v35, -inf }
 0x329   : > { %948 = vmax.xlane.f32.xlu0 %v947_v41 }
 0x32a   : > { %v3461_v42 = vpop.f32.mrb[18].mxu1 }
 0x32b   : > { %v931_v44 = vpop.f32.mrb[19].mxu1  ;;  %v962_v47 = vsel %vm940_vm3, %v3461_v42, -inf }
 0x32c   : > { %963 = vmax.xlane.f32.xlu1 %v962_v47  ;;  %v959_v54 = vsel %vm940_vm3, %v931_v44, -inf }
 0x32d   : > { %954 = vmax.xlane.f32.xlu0 %v953_v28 }
 0x331   : > { %960 = vmax.xlane.f32.xlu0 %v959_v54 }
 0x395   : > { %v4571_v29 = vpop.f32.mrb[20].mxu1 }
 0x396   : > { %v4573_v38 = vpop.f32.mrb[21].mxu1 }
 0x399   : > { %v4575_v55 = vpop.f32.mrb[22].mxu1 }
 0x39a   : > { %v4577_v40 = vpop.f32.mrb[23].mxu1 }
 0x39d   : > { %v4579_v58 = vpop.f32.mrb[24].mxu1 }
 0x39e   : > { %v4581_v59 = vpop.f32.mrb[25].mxu1 }
 0x3a1   : > { %v4583_v49 = vpop.f32.mrb[26].mxu1 }
 0x3a2   : > { %v4585_v60 = vpop.f32.mrb[27].mxu1 }
 0x3ad   : > { %v946_v61 = vpop.xlane.xlu1 %945 }
 0x3ae   : > { %v966_v62 = vsub.f32 %v3452_v17, %v946_v61  ;;  %v943_v63 = vpop.xlane.xlu0 %942 }
 0x3af   : > { %v965_v0 = vsub.f32 %v901_v18, %v943_v63 }
 0x3b0   : > { %v975_v1 = vmul.f32 1.442695, %v966_v62 }
 0x3b1   : > { %v973_v2 = vmul.f32 1.442695, %v965_v0 }
 0x3b2   : > { %4081 = vpow2.f32 %v975_v1  ;;  %v952_v5 = vpop.xlane.xlu0 %951 }
 0x3b3   : > { %4083 = vpow2.f32 %v973_v2  ;;  %v968_v7 = vsub.f32 %v3455_v25, %v952_v5 }
 0x3b5   : > { %v979_v8 = vmul.f32 1.442695, %v968_v7  ;;  %v958_v9 = vpop.xlane.xlu1 %957 }
 0x3b6   : > { %v970_v10 = vsub.f32 %v3458_v31, %v958_v9  ;;  %v949_v11 = vpop.xlane.xlu0 %948  ;;  %v1464_v9 = vsel %vm940_vm3, %v4573_v38, -inf }
 0x3b7   : > { %4085 = vpow2.f32 %v979_v8  ;;  %v967_v13 = vsub.f32 %v911_v26, %v949_v11  ;;  %v1470_v11 = vsel %vm940_vm3, %v4577_v40, -inf }
 0x3b8   : > { %v983_v15 = vmul.f32 1.442695, %v970_v10  ;;  %v1467_v10 = vsel %vm940_vm3, %v4571_v29, -inf }
 0x3b9   : > { %v977_v16 = vmul.f32 1.442695, %v967_v13  ;;  %v964_v23 = vpop.xlane.xlu1 %963  ;;  %v1473_v13 = vsel %vm940_vm3, %v4575_v55, -inf }
 0x3ba   : > { %4087 = vpow2.f32 %v983_v15  ;;  %v972_v24 = vsub.f32 %v3461_v42, %v964_v23  ;;  %v955_v17 = vpop.xlane.xlu0 %954  ;;  %v1479_v15 = vsel %vm940_vm3, %v4579_v58, -inf  ;;  %v1485_v23 = vsel %vm940_vm3, %v4583_v49, -inf }
 0x3bb   : > { %4089 = vpow2.f32 %v977_v16  ;;  %v969_v18 = vsub.f32 %v921_v35, %v955_v17  ;;  %v1476_v16 = vsel %vm940_vm3, %v4581_v59, -inf  ;;  %v759_v17 = vld [vmem:[%s5089_s5] sm:$0xff] }
 0x3bc   : > { %v4587_v30 = vpop.eup %4081  ;;  %v987_v36 = vmul.f32 1.442695, %v972_v24  ;;  %v1482_v24 = vsel %vm940_vm3, %v4585_v60, -inf  ;;  %3490 = vmatprep.subr.mxu0 %v759_v17 }
 0x3bd   : > { %v4589_v41 = vpop.eup %4083  ;;  %v981_v25 = vmul.f32 1.442695, %v969_v18  ;;  %v992_v31 = vsel %vm940_vm3, %v4587_v30, 0.0 }
 0x3be   : > { %4091 = vpow2.f32 %v987_v36  ;;  %993 = vadd.xlane.f32.xlu1 %v992_v31  ;;  %v961_v26 = vpop.xlane.xlu0 %960  ;;  %v989_v47 = vsel %vm940_vm3, %v4589_v41, 0.0 }
 0x3bf   : > { %4093 = vpow2.f32 %v981_v25  ;;  %v971_v42 = vsub.f32 %v931_v44, %v961_v26  ;;  %990 = vadd.xlane.f32.xlu0 %v989_v47 }
 0x3c1   : > { %v4595_v28 = vpop.eup %4085  ;;  %v985_v35 = vmul.f32 1.442695, %v971_v42 }
 0x3c2   : > { %v998_v54 = vsel %vm940_vm3, %v4595_v28, 0.0 }
 0x3c3   : > { %4095 = vpow2.f32 %v985_v35  ;;  %999 = vadd.xlane.f32.xlu1 %v998_v54 }
 0x3c4   : > { %v4599_v61 = vpop.eup %4087 }
 0x3c5   : > { %v4601_v62 = vpop.eup %4089  ;;  %v1004_v63 = vsel %vm940_vm3, %v4599_v61, 0.0 }
 0x3c6   : > { %v995_v0 = vsel %vm940_vm3, %v4601_v62, 0.0 }
 0x3c7   : > { %1005 = vadd.xlane.f32.xlu1 %v1004_v63  ;;  %996 = vadd.xlane.f32.xlu0 %v995_v0 }
 0x3c8   : > { %v4607_v44 = vpop.eup %4091 }
 0x3c9   : > { %v4609_v1 = vpop.eup %4093  ;;  %v1010_v2 = vsel %vm940_vm3, %v4607_v44, 0.0 }
 0x3ca   : > { %v1001_v5 = vsel %vm940_vm3, %v4609_v1, 0.0 }
 0x3cb   : > { %1011 = vadd.xlane.f32.xlu1 %v1010_v2  ;;  %1002 = vadd.xlane.f32.xlu0 %v1001_v5 }
 0x3cd   : > { %v4615_v7 = vpop.eup %4095 }
 0x3ce   : > { %v1007_v8 = vsel %vm940_vm3, %v4615_v7, 0.0 }
 0x3cf   : > { %1008 = vadd.xlane.f32.xlu0 %v1007_v8 }
 0x3dc   : > { %3971 = vrot.lane.b32.xlu1 %v4461_v12, %s4218_s14 }
 0x3e0   : > { %3976 = vrot.lane.b32.xlu1 %v4471_v19, %s4218_s14 }
 0x3e4   : > { %3981 = vrot.lane.b32.xlu1 %v4485_v32, %s4218_s14 }
 0x3e5   : > { %3966 = vrot.lane.b32.xlu0 %v4451_v6, %s4218_s14 }
 0x3e8   : > { %1852 = vrot.lane.b32.xlu1 %v4495_v39, %s4218_s14 }
 0x3e9   : > { %1850 = vrot.lane.b32.xlu0 %v4449_v4, %s4218_s14 }
 0x3ec   : > { %1856 = vrot.lane.b32.xlu1 %v4505_v45, %s4218_s14 }
 0x3ed   : > { %1854 = vrot.lane.b32.xlu0 %v4467_v14, %s4218_s14 }
 0x3f0   : > { %1860 = vrot.lane.b32.xlu1 %v4514_v21, %s4218_s14 }
 0x3f1   : > { %1858 = vrot.lane.b32.xlu0 %v4481_v27, %s4218_s14 }
 0x3f4   : > { %1864 = vrot.lane.b32.xlu1 %v4521_v53, %s4218_s14 }
 0x3f5   : > { %1862 = vrot.lane.b32.xlu0 %v4493_v37, %s4218_s14 }
 0x414   : > { %1465 = vmax.xlane.f32.xlu0 %v1464_v9 }
 0x418   : > { %1468 = vmax.xlane.f32.xlu1 %v1467_v10  ;;  %1471 = vmax.xlane.f32.xlu0 %v1470_v11 }
 0x41c   : > { %1474 = vmax.xlane.f32.xlu0 %v1473_v13  ;;  %1480 = vmax.xlane.f32.xlu1 %v1479_v15 }
 0x420   : > { %1477 = vmax.xlane.f32.xlu0 %v1476_v16  ;;  %1486 = vmax.xlane.f32.xlu1 %v1485_v23 }
 0x424   : > { %1483 = vmax.xlane.f32.xlu0 %v1482_v24 }
 0x431   : > { %3991 = vrot.lane.b32.xlu1 %v4487_v33, %s4217_s13 }
 0x43a   : > { %3986 = vrot.lane.b32.xlu0 %v4473_v22, %s4217_s13 }
 0x44b   : > { %v994_v18 = vpop.xlane.xlu1 %993 }
 0x44c   : > { %4097 = vrcp.f32 %v994_v18  ;;  %v991_v36 = vpop.xlane.xlu0 %990 }
 0x44d   : > { %4099 = vrcp.f32 %v991_v36 }
 0x450   : > { %v1000_v25 = vpop.xlane.xlu1 %999 }
 0x451   : > { %4101 = vrcp.f32 %v1000_v25 }
 0x454   : > { %v1006_v31 = vpop.xlane.xlu1 %1005  ;;  %v997_v26 = vpop.xlane.xlu0 %996 }
 0x455   : > { %4103 = vrcp.f32 %v997_v26 }
 0x456   : > { %v4098_v47 = vpop.eup %4097  ;;  %4105 = vrcp.f32 %v1006_v31 }
 0x457   : > { %v4100_v42 = vpop.eup %4099  ;;  %v1016_v0 = vmul.f32 %v4098_v47, %v4587_v30 }
 0x458   : > { %v1012_v35 = vpop.xlane.xlu1 %1011  ;;  %v1003_v54 = vpop.xlane.xlu0 %1002  ;;  %v1014_v63 = vmul.f32 %v4100_v42, %v4589_v41 }
 0x459   : > { %4107 = vrcp.f32 %v1003_v54 }
 0x45a   : > { %3478 = vmatprep.mubr.msk.f32.mxu0 %vm940_vm3, %v1014_v63 }
 0x45b   : > { %3479 = vmatmul.mubr.msk.f32.vlgmr.msra.gmra.mrb[12].mxu0 %vm940_vm3, %v1016_v0  ;;  %v4102_v8 = vpop.eup %4101 }
 0x45c   : > { %v1009_v2 = vpop.xlane.xlu0 %1008  ;;  %3491 = vmatpush3.msra.mxu0 %v759_v17  ;;  %v3972_v5 = vpop.permute.xlu1 %3971  ;;  %v1020_v24 = vmul.f32 %v4102_v8, %v4595_v28 }
 0x45d   : > { %4109 = vrcp.f32 %v1009_v2  ;;  %v3974_v11 = vunpack.i.h.bf16 %v3972_v5  ;;  %v3973_v13 = vunpack.i.l.bf16 %v3972_v5 }
 0x45e   : > { %4111 = vrcp.f32 %v1012_v35 }
 0x45f   : > { %v4104_v9 = vpop.eup %4103  ;;  %v3824_v36 = vpack.c.bf16 %v3974_v11, %v3973_v13 }
 0x460   : > { %v3967_v10 = vpop.permute.xlu0 %3966  ;;  %v1018_v30 = vmul.f32 %v4104_v9, %v4601_v62  ;;  %v4106_v16 = vpop.eup %4105 }
 0x461   : > { %v3969_v15 = vunpack.i.h.bf16 %v3967_v10  ;;  %v3968_v41 = vunpack.i.l.bf16 %v3967_v10  ;;  %v3977_v31 = vpop.permute.xlu1 %3976  ;;  %v1024_v28 = vmul.f32 %v4106_v16, %v4599_v61 }
 0x462   : > { %3481 = vmatprep.mubr.msk.f32.mxu0 %vm940_vm3, %v1018_v30  ;;  %v3979_v42 = vunpack.i.h.bf16 %v3977_v31  ;;  %v3978_v35 = vunpack.i.l.bf16 %v3977_v31 }
 0x463   : > { %v3818_v23 = vpack.c.bf16 %v3969_v15, %v3968_v41  ;;  %v4108_v18 = vpop.eup %4107  ;;  %3482 = vmatmul.mubr.msk.f32.gmra.mrb[14].mxu0 %vm940_vm3, %v1020_v24 }
 0x464   : > { %v1851_v17 = vpop.permute.xlu0 %1850  ;;  %v1022_v25 = vmul.f32 %v4108_v18, %v4609_v1  ;;  %v3830_v54 = vpack.c.bf16 %v3979_v42, %v3978_v35 }
 0x465   : > { %3820 = vmatprep.subr.msk.bf16.mxu1 %vm4445_vm2, %v3818_v23  ;;  %3590 = vmatprep.mubr.msk.f32.mxu1 %vm786_vm1, %v1851_v17  ;;  %v3982_v63 = vpop.permute.xlu1 %3981 }
 0x466   : > { %3823 = vmatpush3.bf16.xpose.msk.msra.mxu1 %vm4445_vm2, %v3818_v23  ;;  %3484 = vmatprep.mubr.msk.f32.mxu0 %vm940_vm3, %v1022_v25  ;;  %v3984_v61 = vunpack.i.h.bf16 %v3982_v63 }
 0x467   : > { %v4110_v62 = vpop.eup %4109  ;;  %3826 = vmatprep.subr.msk.bf16.mxu1 %vm4445_vm2, %v3824_v36  ;;  %3485 = vmatmul.mubr.msk.f32.gmra.mrb[16].mxu0 %vm940_vm3, %v1024_v28 }
 0x468   : > { %v4112_v26 = vpop.eup %4111  ;;  %v1026_v47 = vmul.f32 %v4110_v62, %v4615_v7  ;;  %v3983_v7 = vunpack.i.l.bf16 %v3982_v63  ;;  %v1855_v2 = vpop.permute.xlu0 %1854 }
 0x469   : > { %v1028_v1 = vmul.f32 %v4112_v26, %v4607_v44  ;;  %v1853_v44 = vpop.permute.xlu1 %1852 }
 0x46a   : > { %3487 = vmatprep.mubr.msk.f32.mxu0 %vm940_vm3, %v1026_v47  ;;  %v3836_v0 = vpack.c.bf16 %v3984_v61, %v3983_v7 }
 0x46b   : > { %3488 = vmatmul.mubr.msk.f32.gmra.mrb[18].mxu0 %vm940_vm3, %v1028_v1 }
 0x46c   : > { %v1859_v8 = vpop.permute.xlu0 %1858 }
 0x46d   : > { %v1857_v5 = vpop.permute.xlu1 %1856 }
 0x46e   : > { %3829 = vmatpush3.bf16.xpose.msk.msra.mxu1 %vm4445_vm2, %v3824_v36 }
 0x46f   : > { %3832 = vmatprep.subr.msk.bf16.mxu1 %vm4445_vm2, %v3830_v54 }
 0x470   : > { %v1863_v10 = vpop.permute.xlu0 %1862 }
 0x471   : > { %v1861_v9 = vpop.permute.xlu1 %1860 }
 0x475   : > { %v1865_v11 = vpop.permute.xlu1 %1864 }
 0x476   : > { %3835 = vmatpush3.bf16.xpose.msk.msra.mxu1 %vm4445_vm2, %v3830_v54 }
 0x477   : > { %3838 = vmatprep.subr.msk.bf16.mxu1 %vm4445_vm2, %v3836_v0 }
 0x47e   : > { %3841 = vmatpush3.bf16.xpose.msk.msra.mxu1 %vm4445_vm2, %v3836_v0 }
 0x485   : > { %3591 = vmatmul.mubr.msk.f32.vlgmr.msra.gmra.mrb[28].mxu1 %vm786_vm1, %v1853_v44 }
 0x486   : > { %3593 = vmatprep.mubr.msk.f32.mxu1 %vm786_vm1, %v1855_v2 }
 0x489   : > { %3594 = vmatmul.mubr.msk.f32.gmra.mrb[30].mxu1 %vm786_vm1, %v1857_v5 }
 0x48a   : > { %3596 = vmatprep.mubr.msk.f32.mxu1 %vm786_vm1, %v1859_v8 }
 0x48d   : > { %3597 = vmatmul.mubr.msk.f32.gmra.mrb[32].mxu1 %vm786_vm1, %v1861_v9 }
 0x48e   : > { %3599 = vmatprep.mubr.msk.f32.mxu1 %vm786_vm1, %v1863_v10 }
 0x491   : > { %3600 = vmatmul.mubr.msk.f32.gmra.mrb[34].mxu1 %vm786_vm1, %v1865_v11 }
 0x4a1   : > { %v1466_v13 = vpop.xlane.xlu0 %1465 }
 0x4a2   : > { %v1488_v15 = vsub.f32 %v4573_v38, %v1466_v13 }
 0x4a4   : > { %v1496_v41 = vmul.f32 1.442695, %v1488_v15 }
 0x4a5   : > { %v1469_v30 = vpop.xlane.xlu1 %1468  ;;  %v1472_v16 = vpop.xlane.xlu0 %1471 }
 0x4a6   : > { %4113 = vpow2.f32 %v1496_v41  ;;  %v1489_v23 = vsub.f32 %v4571_v29, %v1469_v30  ;;  %v1490_v24 = vsub.f32 %v4577_v40, %v1472_v16 }
 0x4a8   : > { %v1498_v18 = vmul.f32 1.442695, %v1489_v23  ;;  %v1500_v17 = vmul.f32 1.442695, %v1490_v24 }
 0x4a9   : > { %v1475_v36 = vpop.xlane.xlu0 %1474  ;;  %v1481_v25 = vpop.xlane.xlu1 %1480 }
 0x4aa   : > { %4115 = vpow2.f32 %v1498_v18  ;;  %v1491_v31 = vsub.f32 %v4575_v55, %v1475_v36  ;;  %v1493_v62 = vsub.f32 %v4579_v58, %v1481_v25 }
 0x4ab   : > { %4117 = vpow2.f32 %v1500_v17 }
 0x4ac   : > { %v1502_v28 = vmul.f32 1.442695, %v1491_v31  ;;  %v1506_v38 = vmul.f32 1.442695, %v1493_v62 }
 0x4ad   : > { %v1478_v26 = vpop.xlane.xlu0 %1477  ;;  %v1487_v47 = vpop.xlane.xlu1 %1486 }
 0x4ae   : > { %4119 = vpow2.f32 %v1502_v28  ;;  %v1492_v42 = vsub.f32 %v4581_v59, %v1478_v26  ;;  %v1495_v29 = vsub.f32 %v4583_v49, %v1487_v47 }
 0x4af   : > { %4121 = vpow2.f32 %v1506_v38 }
 0x4b0   : > { %v4713_v40 = vpop.eup %4113  ;;  %v1504_v35 = vmul.f32 1.442695, %v1492_v42  ;;  %v1510_v1 = vmul.f32 1.442695, %v1495_v29 }
 0x4b1   : > { %v1484_v54 = vpop.xlane.xlu0 %1483  ;;  %v1512_v55 = vsel %vm940_vm3, %v4713_v40, 0.0 }
 0x4b2   : > { %4123 = vpow2.f32 %v1504_v35  ;;  %v1494_v58 = vsub.f32 %v4585_v60, %v1484_v54  ;;  %1513 = vadd.xlane.f32.xlu0 %v1512_v55 }
 0x4b3   : > { %4125 = vpow2.f32 %v1510_v1 }
 0x4b4   : > { %v4718_v63 = vpop.eup %4115  ;;  %v1508_v61 = vmul.f32 1.442695, %v1494_v58 }
 0x4b5   : > { %v4720_v59 = vpop.eup %4117  ;;  %v3987_v49 = vpop.permute.xlu0 %3986  ;;  %v1515_v7 = vsel %vm940_vm3, %v4718_v63, 0.0 }
 0x4b6   : > { %v3989_v0 = vunpack.i.h.bf16 %v3987_v49  ;;  %v3988_v44 = vunpack.i.l.bf16 %v3987_v49  ;;  %1516 = vadd.xlane.f32.xlu1 %v1515_v7  ;;  %v1518_v2 = vsel %vm940_vm3, %v4720_v59, 0.0  ;;  %4127 = vpow2.f32 %v1508_v61 }
 0x4b7   : > { %1519 = vadd.xlane.f32.xlu0 %v1518_v2 }
 0x4b8   : > { %v4726_v5 = vpop.eup %4119  ;;  %v3802_v60 = vpack.c.bf16 %v3989_v0, %v3988_v44 }
 0x4b9   : > { %v1521_v8 = vsel %vm940_vm3, %v4726_v5, 0.0  ;;  %v4730_v9 = vpop.eup %4121 }
 0x4ba   : > { %1522 = vadd.xlane.f32.xlu1 %v1521_v8  ;;  %3803 = vmatprep.subr.bf16.mxu0 %v3802_v60  ;;  %v1527_v11 = vsel %vm940_vm3, %v4730_v9, 0.0 }
 0x4bc   : > { %v4732_v10 = vpop.eup %4123 }
 0x4bd   : > { %v1524_v13 = vsel %vm940_vm3, %v4732_v10, 0.0  ;;  %v4738_v15 = vpop.eup %4125 }
 0x4be   : > { %1528 = vadd.xlane.f32.xlu1 %v1527_v11  ;;  %1525 = vadd.xlane.f32.xlu0 %v1524_v13  ;;  %v1533_v41 = vsel %vm940_vm3, %v4738_v15, 0.0 }
 0x4c0   : > { %v4742_v30 = vpop.eup %4127 }
 0x4c1   : > { %v1530_v16 = vsel %vm940_vm3, %v4742_v30, 0.0 }
 0x4c2   : > { %1534 = vadd.xlane.f32.xlu1 %v1533_v41 }
 0x4c6   : > { %1531 = vadd.xlane.f32.xlu1 %v1530_v16 }
 0x4d4   : > { %3996 = vrot.lane.b32.xlu0 %v4497_v20, %s4217_s13 }
 0x4d7   : > { %4001 = vrot.lane.b32.xlu1 %v4509_v50, %s4217_s13 }
 0x4d8   : > { %4006 = vrot.lane.b32.xlu0 %v4451_v6, %s4219_s17 }
 0x4db   : > { %4011 = vrot.lane.b32.xlu1 %v4461_v12, %s4219_s17 }
 0x4dc   : > { %4016 = vrot.lane.b32.xlu0 %v4471_v19, %s4219_s17 }
 0x4df   : > { %4021 = vrot.lane.b32.xlu1 %v4485_v32, %s4219_s17 }
 0x4e0   : > { %2397 = vrot.lane.b32.xlu0 %v4449_v4, %s4219_s17  ;;  %v3992_v4 = vpop.permute.xlu1 %3991 }
 0x4e1   : > { %v3994_v6 = vunpack.i.h.bf16 %v3992_v4  ;;  %v3993_v12 = vunpack.i.l.bf16 %v3992_v4 }
 0x4e3   : > { %2399 = vrot.lane.b32.xlu1 %v4495_v39, %s4219_s17  ;;  %v3806_v32 = vpack.c.bf16 %v3994_v6, %v3993_v12 }
 0x4e4   : > { %2401 = vrot.lane.b32.xlu0 %v4467_v14, %s4219_s17 }
 0x4e7   : > { %2403 = vrot.lane.b32.xlu1 %v4505_v45, %s4219_s17 }
 0x4e8   : > { %2405 = vrot.lane.b32.xlu0 %v4481_v27, %s4219_s17 }
 0x4eb   : > { %2407 = vrot.lane.b32.xlu1 %v4514_v21, %s4219_s17 }
 0x4ec   : > { %2409 = vrot.lane.b32.xlu0 %v4493_v37, %s4219_s17 }
 0x4ef   : > { %2411 = vrot.lane.b32.xlu1 %v4521_v53, %s4219_s17 }
 0x52e   : > { %v3480_v19 = vpop.f32.mrb[12].mxu0 }
 0x52f   : > { %v1119_v14 = vpop.f32.mrb[13].mxu0 }
 0x530   : > { %3492 = vmatprep.mubr.msk.f32.mxu0 %vm786_vm1, %v1119_v14 }
 0x531   : > { %3493 = vmatmul.mubr.msk.f32.vlgmr.msra.gmra.mrb[20].mxu0 %vm786_vm1, %v3480_v19 }
 0x532   : > { %3805 = vmatpush3.bf16.msra.mxu0 %v3802_v60 }
 0x533   : > { %3807 = vmatprep.subr.bf16.mxu0 %v3806_v32 }
 0x536   : > { %3809 = vmatpush3.bf16.msra.mxu0 %v3806_v32  ;;  %v3483_v27 = vpop.f32.mrb[14].mxu0 }
 0x537   : > { %v1129_v39 = vpop.f32.mrb[15].mxu0 }
 0x538   : > { %3495 = vmatprep.mubr.msk.f32.mxu0 %vm786_vm1, %v1129_v39 }
 0x539   : > { %3496 = vmatmul.mubr.msk.f32.gmra.mrb[22].mxu0 %vm786_vm1, %v3483_v27 }
 0x53a   : > { %v3486_v37 = vpop.f32.mrb[16].mxu0 }
 0x53b   : > { %v1139_v45 = vpop.f32.mrb[17].mxu0 }
 0x53c   : > { %3498 = vmatprep.mubr.msk.f32.mxu0 %vm786_vm1, %v1139_v45 }
 0x53d   : > { %3499 = vmatmul.mubr.msk.f32.gmra.mrb[24].mxu0 %vm786_vm1, %v3486_v37 }
 0x53e   : > { %v3489_v53 = vpop.f32.mrb[18].mxu0 }
 0x53f   : > { %v1514_v21 = vpop.xlane.xlu0 %1513  ;;  %v1149_v23 = vpop.f32.mrb[19].mxu0 }
 0x540   : > { %4129 = vrcp.f32 %v1514_v21  ;;  %3501 = vmatprep.mubr.msk.f32.mxu0 %vm786_vm1, %v1149_v23 }
 0x541   : > { %3502 = vmatmul.mubr.msk.f32.gmra.mrb[26].mxu0 %vm786_vm1, %v3489_v53 }
 0x543   : > { %v1517_v24 = vpop.xlane.xlu1 %1516 }
 0x544   : > { %v1520_v18 = vpop.xlane.xlu0 %1519  ;;  %4131 = vrcp.f32 %v1517_v24 }
 0x545   : > { %4133 = vrcp.f32 %v1520_v18 }
 0x547   : > { %v1523_v17 = vpop.xlane.xlu1 %1522 }
 0x548   : > { %4135 = vrcp.f32 %v1523_v17 }
 0x54a   : > { %v4130_v36 = vpop.eup %4129 }
 0x54b   : > { %v1529_v25 = vpop.xlane.xlu1 %1528  ;;  %v1526_v31 = vpop.xlane.xlu0 %1525  ;;  %v1537_v62 = vmul.f32 %v4130_v36, %v4713_v40 }
 0x54c   : > { %4137 = vrcp.f32 %v1526_v31 }
 0x54d   : > { %3548 = vmatprep.mubr.msk.f32.mxu0 %vm940_vm3, %v1537_v62  ;;  %4139 = vrcp.f32 %v1529_v25 }
 0x54e   : > { %v4132_v8 = vpop.eup %4131 }
 0x54f   : > { %v1535_v28 = vpop.xlane.xlu1 %1534  ;;  %v3997_v38 = vpop.permute.xlu0 %3996  ;;  %v1539_v32 = vmul.f32 %v4132_v8, %v4718_v63 }
 0x550   : > { %v3999_v26 = vunpack.i.h.bf16 %v3997_v38  ;;  %v3998_v47 = vunpack.i.l.bf16 %v3997_v38  ;;  %v4134_v41 = vpop.eup %4133 }
 0x551   : > { %v1541_v45 = vmul.f32 %v4134_v41, %v4720_v59 }
 0x552   : > { %v3810_v42 = vpack.c.bf16 %v3999_v26, %v3998_v47  ;;  %v4136_v37 = vpop.eup %4135 }
 0x553   : > { %v1532_v29 = vpop.xlane.xlu1 %1531  ;;  %v4007_v35 = vpop.permute.xlu0 %4006  ;;  %v1543_v17 = vmul.f32 %v4136_v37, %v4726_v5 }
 0x554   : > { %v4009_v1 = vunpack.i.h.bf16 %v4007_v35  ;;  %v4008_v54 = vunpack.i.l.bf16 %v4007_v35  ;;  %3811 = vmatprep.subr.bf16.mxu0 %v3810_v42  ;;  %4141 = vrcp.f32 %v1532_v29 }
 0x555   : > { %3813 = vmatpush3.bf16.msra.mxu0 %v3810_v42  ;;  %4143 = vrcp.f32 %v1535_v28 }
 0x556   : > { %v3858_v55 = vpack.c.bf16 %v4009_v1, %v4008_v54  ;;  %v4138_v21 = vpop.eup %4137 }
 0x557   : > { %v4002_v58 = vpop.permute.xlu1 %4001  ;;  %v4017_v40 = vpop.permute.xlu0 %4016  ;;  %v1545_v25 = vmul.f32 %v4138_v21, %v4732_v10 }
 0x558   : > { %v4004_v61 = vunpack.i.h.bf16 %v4002_v58  ;;  %v4003_v49 = vunpack.i.l.bf16 %v4002_v58  ;;  %v4784_v7 = vpop.f32.mrb[28].mxu1  ;;  %3860 = vmatprep.subr.msk.bf16.mxu1 %vm4445_vm2, %v3858_v55  ;;  %v4019_v16 = vunpack.i.h.bf16 %v4017_v40  ;;  %v4018_v4 = vunpack.i.l.bf16 %v4017_v40  ;;  %v4140_v36 = vpop.eup %4139 }
 0x559   : > { %v4788_v0 = vpop.f32.mrb[29].mxu1  ;;  %3863 = vmatpush3.bf16.xpose.msk.msra.mxu1 %vm4445_vm2, %v3858_v55  ;;  %v2022_v44 = vsel %vm940_vm3, %v4784_v7, -inf  ;;  %v1547_v10 = vmul.f32 %v4140_v36, %v4730_v9 }
 0x55a   : > { %v3814_v2 = vpack.c.bf16 %v4004_v61, %v4003_v49  ;;  %2023 = vmax.xlane.f32.xlu1 %v2022_v44  ;;  %v2019_v60 = vsel %vm940_vm3, %v4788_v0, -inf  ;;  %v3870_v53 = vpack.c.bf16 %v4019_v16, %v4018_v4 }
 0x55b   : > { %2020 = vmax.xlane.f32.xlu0 %v2019_v60  ;;  %v4012_v11 = vpop.permute.xlu1 %4011  ;;  %v2398_v13 = vpop.permute.xlu0 %2397 }
 0x55c   : > { %v4014_v6 = vunpack.i.h.bf16 %v4012_v11  ;;  %v4013_v12 = vunpack.i.l.bf16 %v4012_v11  ;;  %3815 = vmatprep.subr.bf16.mxu0 %v3814_v2  ;;  %v4796_v19 = vpop.f32.mrb[30].mxu1  ;;  %3660 = vmatprep.mubr.msk.f32.mxu1 %vm786_vm1, %v2398_v13 }
 0x55d   : > { %3817 = vmatpush3.bf16.msra.mxu0 %v3814_v2  ;;  %v4799_v14 = vpop.f32.mrb[31].mxu1  ;;  %v2028_v18 = vsel %vm940_vm3, %v4796_v19, -inf }
 0x55e   : > { %v3864_v27 = vpack.c.bf16 %v4014_v6, %v4013_v12  ;;  %v2025_v39 = vsel %vm940_vm3, %v4799_v14, -inf  ;;  %v4142_v31 = vpop.eup %4141  ;;  %3560 = vmatprep.subr.mxu0 %v760_v3 }
 0x55f   : > { %2026 = vmax.xlane.f32.xlu0 %v2025_v39  ;;  %v4022_v24 = vpop.permute.xlu1 %4021  ;;  %v4144_v42 = vpop.eup %4143  ;;  %v1549_v29 = vmul.f32 %v4142_v31, %v4742_v30 }
 0x560   : > { %3549 = vmatmul.mubr.msk.f32.vlgmr.msra.gmra.mrb[28].mxu0 %vm940_vm3, %v1539_v32  ;;  %v4806_v23 = vpop.f32.mrb[32].mxu1  ;;  %3866 = vmatprep.subr.msk.bf16.mxu1 %vm4445_vm2, %v3864_v27  ;;  %v4024_v62 = vunpack.i.h.bf16 %v4022_v24  ;;  %v4023_v28 = vunpack.i.l.bf16 %v4022_v24  ;;  %v1551_v9 = vmul.f32 %v4144_v42, %v4738_v15  ;;  %v2402_v54 = vpop.permute.xlu0 %2401 }
 0x561   : > { %3551 = vmatprep.mubr.msk.f32.mxu0 %vm940_vm3, %v1541_v45  ;;  %v4811_v63 = vpop.f32.mrb[33].mxu1  ;;  %3869 = vmatpush3.bf16.xpose.msk.msra.mxu1 %vm4445_vm2, %v3864_v27  ;;  %v2034_v59 = vsel %vm940_vm3, %v4806_v23, -inf }
 0x562   : > { %2035 = vmax.xlane.f32.xlu1 %v2034_v59  ;;  %3872 = vmatprep.subr.msk.bf16.mxu1 %vm4445_vm2, %v3870_v53  ;;  %v2031_v5 = vsel %vm940_vm3, %v4811_v63, -inf  ;;  %v3876_v35 = vpack.c.bf16 %v4024_v62, %v4023_v28 }
 0x563   : > { %2029 = vmax.xlane.f32.xlu0 %v2028_v18  ;;  %v2400_v30 = vpop.permute.xlu1 %2399  ;;  %3561 = vmatpush3.msra.mxu0 %v760_v3 }
 0x564   : > { %3552 = vmatmul.mubr.msk.f32.gmra.mrb[30].mxu0 %vm940_vm3, %v1543_v17  ;;  %v4824_v38 = vpop.f32.mrb[34].mxu1  ;;  %v2406_v58 = vpop.permute.xlu0 %2405 }
 0x565   : > { %3554 = vmatprep.mubr.msk.f32.mxu0 %vm940_vm3, %v1545_v25  ;;  %v4827_v26 = vpop.f32.mrb[35].mxu1  ;;  %v2040_v47 = vsel %vm940_vm3, %v4824_v38, -inf }
 0x566   : > { %2041 = vmax.xlane.f32.xlu1 %v2040_v47  ;;  %v2037_v1 = vsel %vm940_vm3, %v4827_v26, -inf }
 0x567   : > { %2032 = vmax.xlane.f32.xlu0 %v2031_v5  ;;  %v2404_v55 = vpop.permute.xlu1 %2403 }
 0x568   : > { %3555 = vmatmul.mubr.msk.f32.gmra.mrb[32].mxu0 %vm940_vm3, %v1547_v10  ;;  %v2410_v40 = vpop.permute.xlu0 %2409 }
 0x569   : > { %3557 = vmatprep.mubr.msk.f32.mxu0 %vm940_vm3, %v1549_v29  ;;  %3875 = vmatpush3.bf16.xpose.msk.msra.mxu1 %vm4445_vm2, %v3870_v53 }
 0x56a   : > { %3878 = vmatprep.subr.msk.bf16.mxu1 %vm4445_vm2, %v3876_v35 }
 0x56b   : > { %2038 = vmax.xlane.f32.xlu0 %v2037_v1  ;;  %v2408_v15 = vpop.permute.xlu1 %2407 }
 0x56c   : > { %3558 = vmatmul.mubr.msk.f32.gmra.mrb[34].mxu0 %vm940_vm3, %v1551_v9 }
 0x56f   : > { %v2412_v61 = vpop.permute.xlu1 %2411 }
 0x571   : > { %3881 = vmatpush3.bf16.xpose.msk.msra.mxu1 %vm4445_vm2, %v3876_v35 }
 0x577   : > { %4031 = vrot.lane.b32.xlu1 %v4487_v33, %s4218_s14 }
 0x578   : > { %3661 = vmatmul.mubr.msk.f32.vlgmr.msra.gmra.mrb[36].mxu1 %vm786_vm1, %v2400_v30 }
 0x579   : > { %3663 = vmatprep.mubr.msk.f32.mxu1 %vm786_vm1, %v2402_v54 }
 0x57c   : > { %3664 = vmatmul.mubr.msk.f32.gmra.mrb[38].mxu1 %vm786_vm1, %v2404_v55 }
 0x57d   : > { %3666 = vmatprep.mubr.msk.f32.mxu1 %vm786_vm1, %v2406_v58 }
 0x580   : > { %3667 = vmatmul.mubr.msk.f32.gmra.mrb[40].mxu1 %vm786_vm1, %v2408_v15 }
 0x581   : > { %4026 = vrot.lane.b32.xlu0 %v4473_v22, %s4218_s14  ;;  %3669 = vmatprep.mubr.msk.f32.mxu1 %vm786_vm1, %v2410_v40 }
 0x584   : > { %3670 = vmatmul.mubr.msk.f32.gmra.mrb[42].mxu1 %vm786_vm1, %v2412_v61 }
 0x5e7   : > { %v2024_v49 = vpop.xlane.xlu1 %2023 }
 0x5e8   : > { %v2044_v44 = vsub.f32 %v4784_v7, %v2024_v49  ;;  %v2021_v2 = vpop.xlane.xlu0 %2020 }
 0x5e9   : > { %v2043_v60 = vsub.f32 %v4788_v0, %v2021_v2 }
 0x5ea   : > { %v2053_v8 = vmul.f32 1.442695, %v2044_v44 }
 0x5eb   : > { %v2051_v11 = vmul.f32 1.442695, %v2043_v60 }
 0x5ec   : > { %4145 = vpow2.f32 %v2053_v8  ;;  %v2027_v13 = vpop.xlane.xlu0 %2026 }
 0x5ed   : > { %4147 = vpow2.f32 %v2051_v11  ;;  %v2045_v41 = vsub.f32 %v4799_v14, %v2027_v13 }
 0x5ef   : > { %v2055_v16 = vmul.f32 1.442695, %v2045_v41  ;;  %v2036_v4 = vpop.xlane.xlu1 %2035 }
 0x5f0   : > { %v2048_v6 = vsub.f32 %v4806_v23, %v2036_v4  ;;  %v2030_v12 = vpop.xlane.xlu0 %2029 }
 0x5f1   : > { %4149 = vpow2.f32 %v2055_v16  ;;  %v2046_v32 = vsub.f32 %v4796_v19, %v2030_v12 }
 0x5f2   : > { %v2061_v27 = vmul.f32 1.442695, %v2048_v6 }
 0x5f3   : > { %v2057_v7 = vmul.f32 1.442695, %v2046_v32  ;;  %v2042_v39 = vpop.xlane.xlu1 %2041 }
 0x5f4   : > { %v2050_v0 = vsub.f32 %v4824_v38, %v2042_v39  ;;  %v2033_v37 = vpop.xlane.xlu0 %2032 }
 0x5f5   : > { %4151 = vpow2.f32 %v2057_v7  ;;  %v2047_v45 = vsub.f32 %v4811_v63, %v2033_v37 }
 0x5f6   : > { %v4868_v21 = vpop.eup %4145  ;;  %4153 = vpow2.f32 %v2061_v27  ;;  %v2065_v53 = vmul.f32 1.442695, %v2050_v0 }
 0x5f7   : > { %v4870_v14 = vpop.eup %4147  ;;  %v2059_v23 = vmul.f32 1.442695, %v2047_v45  ;;  %v2070_v24 = vsel %vm940_vm3, %v4868_v21, 0.0  ;;  %v4032_v30 = vpop.permute.xlu1 %4031 }
 0x5f8   : > { %2071 = vadd.xlane.f32.xlu1 %v2070_v24  ;;  %v2039_v19 = vpop.xlane.xlu0 %2038  ;;  %v2067_v59 = vsel %vm940_vm3, %v4870_v14, 0.0  ;;  %v4034_v54 = vunpack.i.h.bf16 %v4032_v30  ;;  %v4033_v55 = vunpack.i.l.bf16 %v4032_v30  ;;  %v761_v30 = vld [vmem:[%s5089_s5 + $0x10] sm:$0xff] }
 0x5f9   : > { %4155 = vpow2.f32 %v2059_v23  ;;  %v2049_v18 = vsub.f32 %v4827_v26, %v2039_v19  ;;  %2068 = vadd.xlane.f32.xlu0 %v2067_v59 }
 0x5fa   : > { %4157 = vpow2.f32 %v2065_v53  ;;  %v3846_v3 = vpack.c.bf16 %v4034_v54, %v4033_v55 }
 0x5fb   : > { %v4877_v63 = vpop.eup %4149  ;;  %v2063_v17 = vmul.f32 1.442695, %v2049_v18 }
 0x5fc   : > { %v4027_v36 = vpop.permute.xlu0 %4026  ;;  %v2073_v25 = vsel %vm940_vm3, %v4877_v63, 0.0 }
 0x5fd   : > { %v4029_v31 = vunpack.i.h.bf16 %v4027_v36  ;;  %v4028_v62 = vunpack.i.l.bf16 %v4027_v36  ;;  %2074 = vadd.xlane.f32.xlu0 %v2073_v25  ;;  %4159 = vpow2.f32 %v2063_v17 }
 0x5ff   : > { %v4881_v28 = vpop.eup %4151  ;;  %v3842_v38 = vpack.c.bf16 %v4029_v31, %v4028_v62 }
 0x600   : > { %v2076_v47 = vsel %vm940_vm3, %v4881_v28, 0.0  ;;  %v4885_v26 = vpop.eup %4153 }
 0x601   : > { %2077 = vadd.xlane.f32.xlu1 %v2076_v47  ;;  %3843 = vmatprep.subr.bf16.mxu0 %v3842_v38  ;;  %v2082_v10 = vsel %vm940_vm3, %v4885_v26, 0.0 }
 0x603   : > { %v4887_v5 = vpop.eup %4155 }
 0x604   : > { %v2079_v42 = vsel %vm940_vm3, %v4887_v5, 0.0  ;;  %v4893_v29 = vpop.eup %4157 }
 0x605   : > { %2083 = vadd.xlane.f32.xlu1 %v2082_v10  ;;  %2080 = vadd.xlane.f32.xlu0 %v2079_v42  ;;  %v2088_v35 = vsel %vm940_vm3, %v4893_v29, 0.0 }
 0x607   : > { %v4897_v1 = vpop.eup %4159 }
 0x608   : > { %v2085_v9 = vsel %vm940_vm3, %v4897_v1, 0.0 }
 0x609   : > { %2089 = vadd.xlane.f32.xlu1 %v2088_v35 }
 0x60d   : > { %2086 = vadd.xlane.f32.xlu1 %v2085_v9 }
 0x61b   : > { %4036 = vrot.lane.b32.xlu0 %v4497_v20, %s4218_s14 }
 0x61e   : > { %4041 = vrot.lane.b32.xlu1 %v4509_v50, %s4218_s14 }
 0x633   : > { %v3550_v58 = vpop.f32.mrb[28].mxu0 }
 0x634   : > { %v1674_v15 = vpop.f32.mrb[29].mxu0 }
 0x635   : > { %3562 = vmatprep.mubr.msk.f32.mxu0 %vm786_vm1, %v1674_v15 }
 0x636   : > { %3563 = vmatmul.mubr.msk.f32.vlgmr.msra.gmra.mrb[20].mxu0 %vm786_vm1, %v3550_v58 }
 0x637   : > { %3845 = vmatpush3.bf16.msra.mxu0 %v3842_v38  ;;  %v3553_v40 = vpop.f32.mrb[30].mxu0 }
 0x638   : > { %3847 = vmatprep.subr.bf16.mxu0 %v3846_v3  ;;  %v1684_v61 = vpop.f32.mrb[31].mxu0 }
 0x639   : > { %3565 = vmatprep.mubr.msk.f32.mxu0 %vm786_vm1, %v1684_v61 }
 0x63a   : > { %3566 = vmatmul.mubr.msk.f32.gmra.mrb[22].mxu0 %vm786_vm1, %v3553_v40 }
 0x63b   : > { %3849 = vmatpush3.bf16.msra.mxu0 %v3846_v3  ;;  %v3556_v49 = vpop.f32.mrb[32].mxu0 }
 0x63c   : > { %v1694_v44 = vpop.f32.mrb[33].mxu0 }
 0x63d   : > { %3568 = vmatprep.mubr.msk.f32.mxu0 %vm786_vm1, %v1694_v44 }
 0x63e   : > { %3569 = vmatmul.mubr.msk.f32.gmra.mrb[24].mxu0 %vm786_vm1, %v3556_v49 }
 0x63f   : > { %v3559_v2 = vpop.f32.mrb[34].mxu0 }
 0x640   : > { %v1704_v60 = vpop.f32.mrb[35].mxu0 }
 0x641   : > { %3571 = vmatprep.mubr.msk.f32.mxu0 %vm786_vm1, %v1704_v60 }
 0x642   : > { %3572 = vmatmul.mubr.msk.f32.gmra.mrb[26].mxu0 %vm786_vm1, %v3559_v2 }
 0x64b   : > { %v4913_v8 = vpop.f32.mrb[36].mxu1 }
 0x64c   : > { %v4915_v11 = vpop.f32.mrb[37].mxu1  ;;  %v2569_v13 = vsel %vm940_vm3, %v4913_v8, -inf }
 0x64d   : > { %2570 = vmax.xlane.f32.xlu1 %v2569_v13  ;;  %v2566_v41 = vsel %vm940_vm3, %v4915_v11, -inf }
 0x64e   : > { %2567 = vmax.xlane.f32.xlu0 %v2566_v41 }
 0x64f   : > { %v4921_v16 = vpop.f32.mrb[38].mxu1 }
 0x650   : > { %v4923_v4 = vpop.f32.mrb[39].mxu1  ;;  %v2575_v7 = vsel %vm940_vm3, %v4921_v16, -inf }
 0x651   : > { %v2572_v6 = vsel %vm940_vm3, %v4923_v4, -inf }
 0x652   : > { %2573 = vmax.xlane.f32.xlu0 %v2572_v6 }
 0x653   : > { %v4927_v12 = vpop.f32.mrb[40].mxu1 }
 0x654   : > { %v4929_v32 = vpop.f32.mrb[41].mxu1  ;;  %v2581_v27 = vsel %vm940_vm3, %v4927_v12, -inf }
 0x655   : > { %2582 = vmax.xlane.f32.xlu1 %v2581_v27  ;;  %v2578_v45 = vsel %vm940_vm3, %v4929_v32, -inf }
 0x656   : > { %2576 = vmax.xlane.f32.xlu0 %v2575_v7 }
 0x657   : > { %v4935_v39 = vpop.f32.mrb[42].mxu1 }
 0x658   : > { %v4937_v0 = vpop.f32.mrb[43].mxu1  ;;  %v2587_v37 = vsel %vm940_vm3, %v4935_v39, -inf }
 0x659   : > { %2588 = vmax.xlane.f32.xlu1 %v2587_v37  ;;  %v2584_v53 = vsel %vm940_vm3, %v4937_v0, -inf }
 0x65a   : > { %2579 = vmax.xlane.f32.xlu0 %v2578_v45 }
 0x65e   : > { %2585 = vmax.xlane.f32.xlu0 %v2584_v53 }
 0x66a   : > { %4051 = vrot.lane.b32.xlu1 %v4487_v33, %s4219_s17 }
 0x674   : > { %4046 = vrot.lane.b32.xlu0 %v4473_v22, %s4219_s17 }
 0x685   : > { %v2072_v24 = vpop.xlane.xlu1 %2071 }
 0x686   : > { %v2069_v23 = vpop.xlane.xlu0 %2068 }
 0x687   : > { %4161 = vrcp.f32 %v2069_v23 }
 0x688   : > { %4163 = vrcp.f32 %v2072_v24 }
 0x68a   : > { %v2075_v19 = vpop.xlane.xlu0 %2074 }
 0x68b   : > { %4165 = vrcp.f32 %v2075_v19 }
 0x68e   : > { %v2078_v59 = vpop.xlane.xlu1 %2077 }
 0x68f   : > { %4167 = vrcp.f32 %v2078_v59 }
 0x691   : > { %v4162_v18 = vpop.eup %4161 }
 0x692   : > { %v2084_v17 = vpop.xlane.xlu1 %2083  ;;  %v2081_v36 = vpop.xlane.xlu0 %2080  ;;  %v2092_v25 = vmul.f32 %v4162_v18, %v4870_v14 }
 0x693   : > { %4169 = vrcp.f32 %v2081_v36  ;;  %v4164_v9 = vpop.eup %4163 }
 0x694   : > { %3618 = vmatprep.mubr.msk.f32.mxu0 %vm940_vm3, %v2092_v25  ;;  %4171 = vrcp.f32 %v2084_v17  ;;  %v2094_v55 = vmul.f32 %v4164_v9, %v4868_v21 }
 0x695   : > { %v4166_v54 = vpop.eup %4165 }
 0x696   : > { %v2090_v31 = vpop.xlane.xlu1 %2089  ;;  %v4037_v62 = vpop.permute.xlu0 %4036  ;;  %v2096_v15 = vmul.f32 %v4166_v54, %v4877_v63 }
 0x697   : > { %v4039_v38 = vunpack.i.h.bf16 %v4037_v62  ;;  %v4038_v47 = vunpack.i.l.bf16 %v4037_v62 }
 0x699   : > { %v3850_v33 = vpack.c.bf16 %v4039_v38, %v4038_v47  ;;  %v4168_v58 = vpop.eup %4167 }
 0x69a   : > { %v2087_v22 = vpop.xlane.xlu1 %2086  ;;  %v2098_v40 = vmul.f32 %v4168_v58, %v4881_v28 }
 0x69b   : > { %3851 = vmatprep.subr.bf16.mxu0 %v3850_v33  ;;  %4173 = vrcp.f32 %v2087_v22 }
 0x69c   : > { %3853 = vmatpush3.bf16.msra.mxu0 %v3850_v33  ;;  %4175 = vrcp.f32 %v2090_v31 }
 0x69d   : > { %v4170_v3 = vpop.eup %4169 }
 0x69e   : > { %v4042_v10 = vpop.permute.xlu1 %4041  ;;  %v4172_v61 = vpop.eup %4171  ;;  %v2100_v49 = vmul.f32 %v4170_v3, %v4887_v5 }
 0x69f   : > { %v4044_v42 = vunpack.i.h.bf16 %v4042_v10  ;;  %v4043_v35 = vunpack.i.l.bf16 %v4042_v10  ;;  %v2102_v21 = vmul.f32 %v4172_v61, %v4885_v26 }
 0x6a1   : > { %v3854_v14 = vpack.c.bf16 %v4044_v42, %v4043_v35 }
 0x6a3   : > { %3855 = vmatprep.subr.bf16.mxu0 %v3854_v14 }
 0x6a4   : > { %3857 = vmatpush3.bf16.msra.mxu0 %v3854_v14 }
 0x6a5   : > { %3630 = vmatprep.subr.mxu0 %v761_v30  ;;  %v4174_v44 = vpop.eup %4173 }
 0x6a6   : > { %v4176_v2 = vpop.eup %4175  ;;  %v2104_v63 = vmul.f32 %v4174_v44, %v4897_v1 }
 0x6a7   : > { %3619 = vmatmul.mubr.msk.f32.vlgmr.msra.gmra.mrb[36].mxu0 %vm940_vm3, %v2094_v55  ;;  %v2106_v60 = vmul.f32 %v4176_v2, %v4893_v29 }
 0x6a8   : > { %3621 = vmatprep.mubr.msk.f32.mxu0 %vm940_vm3, %v2096_v15  ;;  %3631 = vmatpush3.msra.mxu0 %v761_v30 }
 0x6ab   : > { %3622 = vmatmul.mubr.msk.f32.gmra.mrb[38].mxu0 %vm940_vm3, %v2098_v40 }
 0x6ac   : > { %3624 = vmatprep.mubr.msk.f32.mxu0 %vm940_vm3, %v2100_v49 }
 0x6af   : > { %3625 = vmatmul.mubr.msk.f32.gmra.mrb[40].mxu0 %vm940_vm3, %v2102_v21 }
 0x6b0   : > { %3627 = vmatprep.mubr.msk.f32.mxu0 %vm940_vm3, %v2104_v63 }
 0x6b3   : > { %3628 = vmatmul.mubr.msk.f32.gmra.mrb[42].mxu0 %vm940_vm3, %v2106_v60 }
 0x6da   : > { %v2571_v28 = vpop.xlane.xlu1 %2570 }
 0x6db   : > { %v2591_v5 = vsub.f32 %v4913_v8, %v2571_v28  ;;  %v2568_v13 = vpop.xlane.xlu0 %2567 }
 0x6dc   : > { %v2590_v41 = vsub.f32 %v4915_v11, %v2568_v13 }
 0x6dd   : > { %v2600_v6 = vmul.f32 1.442695, %v2591_v5 }
 0x6de   : > { %v2598_v27 = vmul.f32 1.442695, %v2590_v41 }
 0x6df   : > { %4177 = vpow2.f32 %v2600_v6  ;;  %v2574_v26 = vpop.xlane.xlu0 %2573 }
 0x6e0   : > { %4179 = vpow2.f32 %v2598_v27  ;;  %v2592_v1 = vsub.f32 %v4923_v4, %v2574_v26 }
 0x6e2   : > { %v2602_v7 = vmul.f32 1.442695, %v2592_v1  ;;  %v2583_v37 = vpop.xlane.xlu1 %2582 }
 0x6e3   : > { %v2595_v45 = vsub.f32 %v4927_v12, %v2583_v37  ;;  %v2577_v29 = vpop.xlane.xlu0 %2576 }
 0x6e4   : > { %4181 = vpow2.f32 %v2602_v7  ;;  %v2593_v53 = vsub.f32 %v4921_v16, %v2577_v29 }
 0x6e5   : > { %v2608_v23 = vmul.f32 1.442695, %v2595_v45 }
 0x6e6   : > { %v2604_v8 = vmul.f32 1.442695, %v2593_v53  ;;  %v2589_v24 = vpop.xlane.xlu1 %2588 }
 0x6e7   : > { %v2597_v11 = vsub.f32 %v4935_v39, %v2589_v24  ;;  %v2580_v19 = vpop.xlane.xlu0 %2579 }
 0x6e8   : > { %4183 = vpow2.f32 %v2604_v8  ;;  %v2594_v59 = vsub.f32 %v4929_v32, %v2580_v19 }
 0x6e9   : > { %v4975_v18 = vpop.eup %4177  ;;  %4185 = vpow2.f32 %v2608_v23  ;;  %v2612_v17 = vmul.f32 1.442695, %v2597_v11 }
 0x6ea   : > { %v4977_v4 = vpop.eup %4179  ;;  %v2606_v12 = vmul.f32 1.442695, %v2594_v59  ;;  %v2617_v36 = vsel %vm940_vm3, %v4975_v18, 0.0  ;;  %v4052_v15 = vpop.permute.xlu1 %4051 }
 0x6eb   : > { %2618 = vadd.xlane.f32.xlu1 %v2617_v36  ;;  %v2586_v16 = vpop.xlane.xlu0 %2585  ;;  %v2614_v25 = vsel %vm940_vm3, %v4977_v4, 0.0  ;;  %v4054_v3 = vunpack.i.h.bf16 %v4052_v15  ;;  %v4053_v40 = vunpack.i.l.bf16 %v4052_v15 }
 0x6ec   : > { %4187 = vpow2.f32 %v2606_v12  ;;  %v2596_v39 = vsub.f32 %v4937_v0, %v2586_v16  ;;  %2615 = vadd.xlane.f32.xlu0 %v2614_v25 }
 0x6ed   : > { %4189 = vpow2.f32 %v2612_v17  ;;  %v3886_v21 = vpack.c.bf16 %v4054_v3, %v4053_v40 }
 0x6ee   : > { %v4984_v32 = vpop.eup %4181  ;;  %v2610_v31 = vmul.f32 1.442695, %v2596_v39 }
 0x6ef   : > { %v4047_v62 = vpop.permute.xlu0 %4046  ;;  %v2620_v38 = vsel %vm940_vm3, %v4984_v32, 0.0 }
 0x6f0   : > { %v4049_v47 = vunpack.i.h.bf16 %v4047_v62  ;;  %v4048_v33 = vunpack.i.l.bf16 %v4047_v62  ;;  %2621 = vadd.xlane.f32.xlu0 %v2620_v38  ;;  %4191 = vpow2.f32 %v2610_v31 }
 0x6f2   : > { %v4988_v22 = vpop.eup %4183  ;;  %v3882_v10 = vpack.c.bf16 %v4049_v47, %v4048_v33 }
 0x6f3   : > { %v2623_v42 = vsel %vm940_vm3, %v4988_v22, 0.0  ;;  %v4992_v0 = vpop.eup %4185 }
 0x6f4   : > { %2624 = vadd.xlane.f32.xlu1 %v2623_v42  ;;  %3883 = vmatprep.subr.bf16.mxu0 %v3882_v10  ;;  %v2629_v14 = vsel %vm940_vm3, %v4992_v0, 0.0 }
 0x6f6   : > { %v4994_v35 = vpop.eup %4187 }
 0x6f7   : > { %v2626_v9 = vsel %vm940_vm3, %v4994_v35, 0.0  ;;  %v5000_v30 = vpop.eup %4189 }
 0x6f8   : > { %2630 = vadd.xlane.f32.xlu1 %v2629_v14  ;;  %2627 = vadd.xlane.f32.xlu0 %v2626_v9  ;;  %v2635_v54 = vsel %vm940_vm3, %v5000_v30, 0.0 }
 0x6fa   : > { %v5004_v55 = vpop.eup %4191 }
 0x6fb   : > { %v2632_v58 = vsel %vm940_vm3, %v5004_v55, 0.0 }
 0x6fc   : > { %2636 = vadd.xlane.f32.xlu1 %v2635_v54  ;;  %v3041_v54 = vld [vmem:[%s5090_s6] ss:$0 sm:$0xff] }
 0x6fd   : > { %v770_v15 = vadd.f32 %v3041_v54, %v4379_v52  ;;  %v775_v52 = vadd.f32 %v3041_v54, %v4367_v43 }
 0x700   : > { %2633 = vadd.xlane.f32.xlu1 %v2632_v58 }
 0x70e   : > { %4056 = vrot.lane.b32.xlu0 %v4497_v20, %s4219_s17 }
 0x711   : > { %4061 = vrot.lane.b32.xlu1 %v4509_v50, %s4219_s17 }
 0x778   : > { %v2619_v2 = vpop.xlane.xlu1 %2618 }
 0x779   : > { %v2616_v61 = vpop.xlane.xlu0 %2615 }
 0x77a   : > { %v3620_v49 = vpop.f32.mrb[36].mxu0  ;;  %4193 = vrcp.f32 %v2616_v61 }
 0x77b   : > { %v2221_v44 = vpop.f32.mrb[37].mxu0  ;;  %4195 = vrcp.f32 %v2619_v2 }
 0x77c   : > { %3632 = vmatprep.mubr.msk.f32.mxu0 %vm786_vm1, %v2221_v44  ;;  %v772_v44 = vadd.f32 %v3041_v54, %v4397_v57  ;;  %v777_v57 = vadd.f32 %v3041_v54, %v4377_v51 }
 0x77d   : > { %3633 = vmatmul.mubr.msk.f32.vlgmr.msra.gmra.mrb[20].mxu0 %vm786_vm1, %v3620_v49  ;;  %v2622_v50 = vpop.xlane.xlu0 %2621 }
 0x77e   : > { %3885 = vmatpush3.bf16.msra.mxu0 %v3882_v10  ;;  %v3623_v63 = vpop.f32.mrb[38].mxu0  ;;  %4197 = vrcp.f32 %v2622_v50 }
 0x77f   : > { %3887 = vmatprep.subr.bf16.mxu0 %v3886_v21  ;;  %v2231_v20 = vpop.f32.mrb[39].mxu0 }
 0x780   : > { %3635 = vmatprep.mubr.msk.f32.mxu0 %vm786_vm1, %v2231_v20 }
 0x781   : > { %v2625_v60 = vpop.xlane.xlu1 %2624  ;;  %3636 = vmatmul.mubr.msk.f32.gmra.mrb[22].mxu0 %vm786_vm1, %v3623_v63 }
 0x782   : > { %3889 = vmatpush3.bf16.msra.mxu0 %v3886_v21  ;;  %v3626_v28 = vpop.f32.mrb[40].mxu0  ;;  %4199 = vrcp.f32 %v2625_v60 }
 0x783   : > { %v2241_v5 = vpop.f32.mrb[41].mxu0 }
 0x784   : > { %3638 = vmatprep.mubr.msk.f32.mxu0 %vm786_vm1, %v2241_v5  ;;  %v4194_v13 = vpop.eup %4193 }
 0x785   : > { %v2631_v41 = vpop.xlane.xlu1 %2630  ;;  %v2628_v6 = vpop.xlane.xlu0 %2627  ;;  %3639 = vmatmul.mubr.msk.f32.gmra.mrb[24].mxu0 %vm786_vm1, %v3626_v28  ;;  %v2639_v1 = vmul.f32 %v4194_v13, %v4977_v4  ;;  %v762_v4 = vld [vmem:[%s5089_s5 + $0x18] sm:$0xff]  ;;  %v776_v13 = vadd.f32 %v3041_v54, %v4369_v46 }
 0x786   : > { %v3629_v27 = vpop.f32.mrb[42].mxu0  ;;  %4201 = vrcp.f32 %v2628_v6  ;;  %v4196_v59 = vpop.eup %4195 }
 0x787   : > { %v2251_v26 = vpop.f32.mrb[43].mxu0  ;;  %4203 = vrcp.f32 %v2631_v41  ;;  %v2641_v12 = vmul.f32 %v4196_v59, %v4975_v18 }
 0x788   : > { %3641 = vmatprep.mubr.msk.f32.mxu0 %vm786_vm1, %v2251_v26  ;;  %v4198_v17 = vpop.eup %4197 }
 0x789   : > { %v2637_v7 = vpop.xlane.xlu1 %2636  ;;  %v4057_v37 = vpop.permute.xlu0 %4056  ;;  %3642 = vmatmul.mubr.msk.f32.gmra.mrb[26].mxu0 %vm786_vm1, %v3629_v27  ;;  %v2643_v16 = vmul.f32 %v4198_v17, %v4984_v32 }
 0x78a   : > { %v4059_v45 = vunpack.i.h.bf16 %v4057_v37  ;;  %v4058_v29 = vunpack.i.l.bf16 %v4057_v37  ;;  %3688 = vmatprep.mubr.msk.f32.mxu0 %vm940_vm3, %v2639_v1 }
 0x78c   : > { %v3890_v53 = vpack.c.bf16 %v4059_v45, %v4058_v29  ;;  %v4200_v36 = vpop.eup %4199 }
 0x78d   : > { %v2634_v23 = vpop.xlane.xlu1 %2633  ;;  %v2645_v39 = vmul.f32 %v4200_v36, %v4988_v22 }
 0x78e   : > { %3891 = vmatprep.subr.bf16.mxu0 %v3890_v53  ;;  %4205 = vrcp.f32 %v2634_v23 }
 0x78f   : > { %3893 = vmatpush3.bf16.msra.mxu0 %v3890_v53  ;;  %4207 = vrcp.f32 %v2637_v7 }
 0x790   : > { %v4202_v25 = vpop.eup %4201 }
 0x791   : > { %v4062_v8 = vpop.permute.xlu1 %4061  ;;  %v4204_v31 = vpop.eup %4203  ;;  %v2647_v62 = vmul.f32 %v4202_v25, %v4994_v35 }
 0x792   : > { %v4064_v24 = vunpack.i.h.bf16 %v4062_v8  ;;  %v4063_v11 = vunpack.i.l.bf16 %v4062_v8  ;;  %v2649_v18 = vmul.f32 %v4204_v31, %v4992_v0 }
 0x794   : > { %v3894_v19 = vpack.c.bf16 %v4064_v24, %v4063_v11 }
 0x796   : > { %3895 = vmatprep.subr.bf16.mxu0 %v3894_v19 }
 0x797   : > { %3897 = vmatpush3.bf16.msra.mxu0 %v3894_v19 }
 0x798   : > { %3700 = vmatprep.subr.mxu0 %v762_v4  ;;  %v4206_v38 = vpop.eup %4205 }
 0x799   : > { %v4208_v47 = vpop.eup %4207  ;;  %v2651_v32 = vmul.f32 %v4206_v38, %v5004_v55  ;;  %v771_v55 = vadd.f32 %v3041_v54, %v4395_v56  ;;  %v773_v56 = vadd.f32 %v3041_v54, %v4409_v48  ;;  %v774_v48 = vadd.f32 %v3041_v54, %v4355_v34 }
 0x79a   : > { %3689 = vmatmul.mubr.msk.f32.vlgmr.msra.gmra.mrb[44].mxu0 %vm940_vm3, %v2641_v12  ;;  %v2653_v33 = vmul.f32 %v4208_v47, %v5000_v30 }
 0x79b   : > { %3691 = vmatprep.mubr.msk.f32.mxu0 %vm940_vm3, %v2643_v16  ;;  %3701 = vmatpush3.msra.mxu0 %v762_v4 }
 0x79e   : > { %3692 = vmatmul.mubr.msk.f32.gmra.mrb[46].mxu0 %vm940_vm3, %v2645_v39 }
 0x79f   : > { %3694 = vmatprep.mubr.msk.f32.mxu0 %vm940_vm3, %v2647_v62 }
 0x7a2   : > { %3695 = vmatmul.mubr.msk.f32.gmra.mrb[48].mxu0 %vm940_vm3, %v2649_v18 }
 0x7a3   : > { %3697 = vmatprep.mubr.msk.f32.mxu0 %vm940_vm3, %v2651_v32 }
 0x7a6   : > { %3698 = vmatmul.mubr.msk.f32.gmra.mrb[50].mxu0 %vm940_vm3, %v2653_v33 }
 0x86d   : > { %v3690_v22 = vpop.f32.mrb[44].mxu0 }
 0x86e   : > { %v2768_v10 = vpop.f32.mrb[45].mxu0 }
 0x86f   : > { %3702 = vmatprep.mubr.msk.f32.mxu0 %vm786_vm1, %v2768_v10 }
 0x870   : > { %3703 = vmatmul.mubr.msk.f32.vlgmr.msra.gmra.mrb[20].mxu0 %vm786_vm1, %v3690_v22 }
 0x871   : > { %v3693_v42 = vpop.f32.mrb[46].mxu0 }
 0x872   : > { %v2778_v0 = vpop.f32.mrb[47].mxu0 }
 0x873   : > { %3705 = vmatprep.mubr.msk.f32.mxu0 %vm786_vm1, %v2778_v0 }
 0x874   : > { %3706 = vmatmul.mubr.msk.f32.gmra.mrb[22].mxu0 %vm786_vm1, %v3693_v42 }
 0x875   : > { %v3696_v35 = vpop.f32.mrb[48].mxu0 }
 0x876   : > { %v2788_v14 = vpop.f32.mrb[49].mxu0 }
 0x877   : > { %3708 = vmatprep.mubr.msk.f32.mxu0 %vm786_vm1, %v2788_v14 }
 0x878   : > { %3709 = vmatmul.mubr.msk.f32.gmra.mrb[24].mxu0 %vm786_vm1, %v3696_v35 }
 0x879   : > { %v3699_v9 = vpop.f32.mrb[50].mxu0 }
 0x87a   : > { %v2798_v30 = vpop.f32.mrb[51].mxu0 }
 0x87b   : > { %3711 = vmatprep.mubr.msk.f32.mxu0 %vm786_vm1, %v2798_v30 }
 0x87c   : > { %3712 = vmatmul.mubr.msk.f32.gmra.mrb[26].mxu0 %vm786_vm1, %v3699_v9 }
 0x943   : > { %v3704_v58 = vpop.f32.mrb[20].mxu0 }
 0x944   : > { %v3902_v3 = vadd.f32 %v3704_v58, %v771_v55  ;;  %v2897_v40 = vpop.f32.mrb[21].mxu0 }
 0x945   : > { %v3903_v61 = vadd.f32 %v2897_v40, %v770_v15 }
 0x946   : > { %2945 = vst.msk [vmem:[%s5056_s8 + $0x8] sm:$0xff] %vm288_vm0, %v3902_v3 }
 0x947   : > { %2944 = vst.msk [vmem:[%s5056_s8] sm:$0xff] %vm288_vm0, %v3903_v61  ;;  %v3707_v49 = vpop.f32.mrb[22].mxu0 }
 0x948   : > { %v3904_v21 = vadd.f32 %v3707_v49, %v773_v56  ;;  %v2907_v2 = vpop.f32.mrb[23].mxu0 }
 0x949   : > { %v3905_v63 = vadd.f32 %v2907_v2, %v772_v44 }
 0x94a   : > { %2947 = vst.msk [vmem:[%s5056_s8 + $0x18] sm:$0xff] %vm288_vm0, %v3904_v21 }
 0x94b   : > { %2946 = vst.msk [vmem:[%s5056_s8 + $0x10] sm:$0xff] %vm288_vm0, %v3905_v63  ;;  %v3710_v20 = vpop.f32.mrb[24].mxu0 }
 0x94c   : > { %v3906_v50 = vadd.f32 %v3710_v20, %v775_v52  ;;  %v2917_v60 = vpop.f32.mrb[25].mxu0 }
 0x94d   : > { %v3907_v28 = vadd.f32 %v2917_v60, %v774_v48 }
 0x94e   : > { %2949 = vst.msk [vmem:[%s5056_s8 + $0x28] sm:$0xff] %vm288_vm0, %v3906_v50 }
 0x94f   : > { %2948 = vst.msk [vmem:[%s5056_s8 + $0x20] sm:$0xff] %vm288_vm0, %v3907_v28  ;;  %v3713_v5 = vpop.f32.mrb[26].mxu0 }
 0x950   : > { %v3908_v41 = vadd.f32 %v3713_v5, %v777_v57  ;;  %v2927_v43 = vpop.f32.mrb[27].mxu0 }
 0x951   : > { %v3909_v6 = vadd.f32 %v2927_v43, %v776_v13 }
 0x952   : > { %2951 = vst.msk [vmem:[%s5056_s8 + $0x38] sm:$0xff] %vm288_vm0, %v3908_v41 }
 0x953   : > { %2950 = vst.msk [vmem:[%s5056_s8 + $0x30] sm:$0xff] %vm288_vm0, %v3909_v6 }
 0x954 PF: > { %s17_s24 = sadd.s32 1, %s4215_s24  }
 0x955   : > { %p14_p4 = scmp.ge.s32.totalorder %s17_s24, 4  }
 0x957   :  { %16 = sbr.rel (!%p14_p4) target bundleno = 1 (0x1), region = 78 }

</bundles_post_ra>
